<compile_context>
chip_gen: v7x
topology: tpu7x:2x2x1
jax: 0.10.0
libtpu: 0.0.40
codegen_flags: <defaults>
</compile_context>

<pallas_src>
import functools
import numpy as np
import jax
import jax.numpy as jnp
from jax.experimental import pallas as pl
from jax.experimental.pallas import tpu as pltpu

D_MODEL = 32
NUM_HEADS = 4
D_K = D_MODEL // NUM_HEADS


# ----------------------------- kernel ---------------------------------------

def _mha_block(x, w, b, *, num_heads, d_k):
    """Multi-head self-attention on a (TB, S, D) slab, entirely in VMEM.

    w: (D, 4D) = [Wq | Wk | Wv | Wo] (already (in, out) layout; Wq pre-scaled
       by 1/sqrt(d_k)).
    b: (1, 4D) = [bq | bk | bv | bo] (bq pre-scaled).
    """
    TB, S, D = x.shape
    x2 = x.reshape(TB * S, D)                       # flatten: big MXU M dim
    wqkv, wo = w[:, :3 * D], w[:, 3 * D:]
    bqkv, bo = b[:, :3 * D], b[:, 3 * D:]

    # One fused QKV projection instead of three K=32 dots.
    qkv = jnp.dot(x2, wqkv, preferred_element_type=jnp.float32) + bqkv  # (TB*S, 3D)
    qkv = qkv.reshape(TB, S, 3 * D)

    acc = jnp.zeros((TB * S, D), jnp.float32)       # accumulated Wo projection
    for h in range(num_heads):                      # small static head count
        lo = h * d_k
        qh = qkv[:, :, lo:lo + d_k]                 # already scaled via packed Wq
        kh = qkv[:, :, D + lo:D + lo + d_k]
        vh = qkv[:, :, 2 * D + lo:2 * D + lo + d_k]

        # q·kᵀ as a batched dot contracting last dims (no .T materialized).
        s = jnp.einsum('bqd,bkd->bqk', qh, kh,
                       preferred_element_type=jnp.float32)       # (TB, S, S)
        m = jnp.max(s, axis=-1, keepdims=True)
        e = jnp.exp(s - m)
        l = jnp.sum(e, axis=-1, keepdims=True)
        o_h = jnp.einsum('bqk,bkd->bqd', e, vh,
                         preferred_element_type=jnp.float32)     # (TB, S, d_k)
        # Normalize after the p@V matmul; reciprocal on the EUP slot.
        o_h = o_h * pl.reciprocal(l, approx=True)

        # Accumulate the output projection per head (no head concat).
        acc = acc + jnp.dot(o_h.reshape(TB * S, d_k), wo[lo:lo + d_k, :],
                            preferred_element_type=jnp.float32)  # (TB*S, D)
    return (acc + bo).reshape(TB, S, D)


def _rec_kernel(u_ref, m_ref, w_ref, b_ref, wf_ref, bf_ref, out_ref,
                *, num_heads, d_k):
    w = w_ref[...]                                   # (2, D, 4D)
    b = b_ref[...]                                   # (2, 4D)

    user_attn = _mha_block(u_ref[...], w[0], b[0:1, :],
                           num_heads=num_heads, d_k=d_k)         # (TB, S_u, D)
    movie_attn = _mha_block(m_ref[...], w[1], b[1:2, :],
                            num_heads=num_heads, d_k=d_k)        # (TB, S_m, D)

    # Reassociated tail:
    #   out[b,u] = sum_m (UA·MAᵀ)[b,u,m] * wf[m] + bf
    #            = sum_d UA[b,u,d] * (sum_m wf[m] * MA[b,m,d]) + bf
    # -> never materialize the (S_u, S_m) scores matrix or movie_attn.T.
    v = jnp.sum(movie_attn * wf_ref[...], axis=1)                # (TB, D)
    out = jnp.sum(user_attn * v[:, None, :], axis=-1)            # (TB, S_u)
    out_ref[...] = out + bf_ref[0]                               # lane-dense slab


# ----------------------------- wrapper ---------------------------------------

def _choose_tb(batch, max_tb=128):
    """Batch tile: divides B; multiple of 8 (or == B) so the (TB, S_u) output
    block is sublane-legal; prefer >= 2 grid steps (v7x has 2 TensorCores)."""
    cands = [d for d in range(8, min(batch, max_tb) + 1, 8) if batch % d == 0]
    multi = [d for d in cands if batch // d >= 2]
    if multi:
        return max(multi)
    if cands:
        return max(cands)
    return batch  # tiny batches: one grid step, block == full array


def pack_params(p):
    """Pack 18 PyTorch-layout params into 4 kernel arrays.

    1/sqrt(d_k) is folded into Wq/bq here (tiny one-off in the wrapper) so the
    kernel never spends VPU cycles rescaling activations.
    """
    scale = jnp.float32(1.0 / np.sqrt(D_K))

    def stream(prefix):
        w = jnp.concatenate([p[prefix + "wq"] * scale, p[prefix + "wk"],
                             p[prefix + "wv"], p[prefix + "wo"]], axis=1)  # (D, 4D)
        b = jnp.concatenate([p[prefix + "bq"] * scale, p[prefix + "bk"],
                             p[prefix + "bv"], p[prefix + "bo"]], axis=1)  # (1, 4D)
        return w, b

    uw, ub = stream("u")
    mw, mb = stream("m")
    w_attn = jnp.stack([uw, mw], axis=0)                 # (2, D, 4D) ; 4D = 128 lanes
    b_attn = jnp.concatenate([ub, mb], axis=0)           # (2, 4D)
    wf_col = p["wf"].reshape(1, D_MODEL, 1)              # (1, S_m, 1) for broadcast
    bf = p["bf"].reshape((1,))                           # scalar, lives in SMEM
    return w_attn, b_attn, wf_col, bf


def recommender_forward(user_vectors, movie_vectors, params, *, max_tb=128):
    B, S_u, D = user_vectors.shape
    Bm, S_m, Dm = movie_vectors.shape
    assert Bm == B and Dm == D == D_MODEL
    assert S_m == D, "final Linear(d_model, 1) requires S_movie == d_model"

    w_attn, b_attn, wf_col, bf = pack_params(params)
    TB = _choose_tb(B, max_tb)
    grid = (B // TB,)

    kernel = functools.partial(_rec_kernel, num_heads=NUM_HEADS, d_k=D_K)

    out = pl.pallas_call(
        kernel,
        out_shape=jax.ShapeDtypeStruct((B, S_u), jnp.float32),
        grid_spec=pltpu.PrefetchScalarGridSpec(
            num_scalar_prefetch=0,
            grid=grid,
            in_specs=[
                pl.BlockSpec((TB, S_u, D), lambda g: (g, 0, 0)),
                pl.BlockSpec((TB, S_m, D), lambda g: (g, 0, 0)),
                pl.BlockSpec((2, D, 4 * D), lambda g: (0, 0, 0)),   # weights: same block every step
                pl.BlockSpec((2, 4 * D), lambda g: (0, 0)),
                pl.BlockSpec((1, S_m, 1), lambda g: (0, 0, 0)),
                pl.BlockSpec(memory_space=pltpu.MemorySpace.SMEM),  # bf scalar
            ],
            out_specs=pl.BlockSpec((TB, S_u), lambda g: (g, 0)),
        ),
        compiler_params=pltpu.CompilerParams(
            dimension_semantics=("parallel",)),
    )(user_vectors, movie_vectors, w_attn, b_attn, wf_col, bf)

    return out  # (B, S_u) == PyTorch .squeeze(-1)


# --------------------------- params & reference -------------------------------

def _linear_params(key, fan_in, fan_out):
    bound = 1.0 / np.sqrt(fan_in)
    kw, kb = jax.random.split(key)
    w = jax.random.uniform(kw, (fan_in, fan_out), jnp.float32, -bound, bound)
    b = jax.random.uniform(kb, (1, fan_out), jnp.float32, -bound, bound)
    return w, b


def init_params(key):
    keys = jax.random.split(key, 9)
    params = {}
    names = ["uwq", "uwk", "uwv", "uwo", "mwq", "mwk", "mwv", "mwo"]
    bnames = ["ubq", "ubk", "ubv", "ubo", "mbq", "mbk", "mbv", "mbo"]
    for i, (wn, bn) in enumerate(zip(names, bnames)):
        w, b = _linear_params(keys[i], D_MODEL, D_MODEL)
        params[wn], params[bn] = w, b
    wf, bf = _linear_params(keys[8], D_MODEL, 1)
    params["wf"], params["bf"] = wf, bf
    return params


def _mha_ref(x, wq, bq, wk, bk, wv, bv, wo, bo):
    B, S, D = x.shape
    q = (x @ wq + bq).reshape(B, S, NUM_HEADS, D_K).transpose(0, 2, 1, 3)
    k = (x @ wk + bk).reshape(B, S, NUM_HEADS, D_K).transpose(0, 2, 1, 3)
    v = (x @ wv + bv).reshape(B, S, NUM_HEADS, D_K).transpose(0, 2, 1, 3)
    s = jnp.einsum("bhqd,bhkd->bhqk", q, k) / jnp.sqrt(jnp.float32(D_K))
    p = jax.nn.softmax(s, axis=-1)
    a = jnp.einsum("bhqk,bhkd->bhqd", p, v)
    a = a.transpose(0, 2, 1, 3).reshape(B, S, D)
    return a @ wo + bo


def reference_forward(user_vectors, movie_vectors, p):
    ua = _mha_ref(user_vectors, p["uwq"], p["ubq"], p["uwk"], p["ubk"],
                  p["uwv"], p["ubv"], p["uwo"], p["ubo"])
    ma = _mha_ref(movie_vectors, p["mwq"], p["mbq"], p["mwk"], p["mbk"],
                  p["mwv"], p["mbv"], p["mwo"], p["mbo"])
    scores = jnp.einsum("bud,bmd->bum", ua, ma)
    return (scores @ p["wf"] + p["bf"])[..., 0]


# ------------------------------- main -----------------------------------------

if __name__ == "__main__":
    key = jax.random.PRNGKey(0)
    B, S_U = 2, 8
    S_M = D_MODEL  # required by the PyTorch model's final Linear

    k1, k2, k3 = jax.random.split(key, 3)
    user_vectors = jax.random.normal(k1, (B, S_U, D_MODEL), jnp.float32)
    movie_vectors = jax.random.normal(k2, (B, S_M, D_MODEL), jnp.float32)
    params = init_params(k3)

    out = recommender_forward(user_vectors, movie_vectors, params)
    out = jax.block_until_ready(out)

    ref = reference_forward(user_vectors, movie_vectors, params)
    assert out.shape == (B, S_U)
    # 2e-3 tolerance: the kernel uses pl.reciprocal(approx=True) for the
    # softmax denominator; structural errors would be orders of magnitude larger.
    np.testing.assert_allclose(np.asarray(out), np.asarray(ref),
                               rtol=2e-3, atol=2e-3)
    print("KERNEL_OK")
</pallas_src>

<mosaic_0001>
module attributes {stable_mosaic.version = 11 : i64} {
  func.func @_rec_kernel(%arg0: i32, %arg1: memref<2x8x32xf32, #tpu.memory_space<vmem>>, %arg2: memref<2x32x32xf32, #tpu.memory_space<vmem>>, %arg3: memref<2x32x128xf32, #tpu.memory_space<vmem>>, %arg4: memref<2x128xf32, #tpu.memory_space<vmem>>, %arg5: memref<1x32x1xf32, #tpu.memory_space<vmem>>, %arg6: memref<1xf32, #tpu.memory_space<smem>>, %arg7: memref<2x8xf32, #tpu.memory_space<vmem>>) attributes {dimension_semantics = [#tpu.dimension_semantics<parallel>], iteration_bounds = array<i64: 1>, scalar_prefetch = 0 : i64, scratch_operands = 0 : i64, tpu.core_type = #tpu.core_type<tc>, window_params = [{transform_indices = @transform_0, window_bounds = array<i64: 2, 8, 32>}, {transform_indices = @transform_1, window_bounds = array<i64: 2, 32, 32>}, {pipeline_mode = #tpu.pipeline_mode<synchronous>, transform_indices = @transform_2, window_bounds = array<i64: 2, 32, 128>}, {pipeline_mode = #tpu.pipeline_mode<synchronous>, transform_indices = @transform_3, window_bounds = array<i64: 2, 128>}, {pipeline_mode = #tpu.pipeline_mode<synchronous>, transform_indices = @transform_4, window_bounds = array<i64: 1, 32, 1>}, {transform_indices = @transform_5, window_bounds = array<i64: 1>}, {transform_indices = @transform_6, window_bounds = array<i64: 2, 8>}]} {
    %c0 = arith.constant 0 : index
    %c0_0 = arith.constant 0 : index
    %c0_1 = arith.constant 0 : index
    %0 = vector.load %arg3[%c0, %c0_0, %c0_1] : memref<2x32x128xf32, #tpu.memory_space<vmem>>, vector<2x32x128xf32>
    %c0_2 = arith.constant 0 : index
    %c0_3 = arith.constant 0 : index
    %1 = vector.load %arg4[%c0_2, %c0_3] : memref<2x128xf32, #tpu.memory_space<vmem>>, vector<2x128xf32>
    %c0_4 = arith.constant 0 : index
    %c0_5 = arith.constant 0 : index
    %c0_6 = arith.constant 0 : index
    %2 = vector.load %arg1[%c0_4, %c0_5, %c0_6] : memref<2x8x32xf32, #tpu.memory_space<vmem>>, vector<2x8x32xf32>
    %3 = vector.extract_strided_slice %0 {offsets = [0, 0, 0], sizes = [1, 32, 128], strides = [1, 1, 1]} : vector<2x32x128xf32> to vector<1x32x128xf32>
    %4 = vector.shape_cast %3 : vector<1x32x128xf32> to vector<32x128xf32>
    %5 = vector.extract_strided_slice %1 {offsets = [0, 0], sizes = [1, 128], strides = [1, 1]} : vector<2x128xf32> to vector<1x128xf32>
    %6 = vector.shape_cast %2 : vector<2x8x32xf32> to vector<16x32xf32>
    %7 = vector.extract_strided_slice %4 {offsets = [0, 0], sizes = [32, 96], strides = [1, 1]} : vector<32x128xf32> to vector<32x96xf32>
    %8 = vector.extract_strided_slice %4 {offsets = [0, 96], sizes = [32, 32], strides = [1, 1]} : vector<32x128xf32> to vector<32x32xf32>
    %9 = vector.extract_strided_slice %5 {offsets = [0, 0], sizes = [1, 96], strides = [1, 1]} : vector<1x128xf32> to vector<1x96xf32>
    %10 = vector.extract_strided_slice %5 {offsets = [0, 96], sizes = [1, 32], strides = [1, 1]} : vector<1x128xf32> to vector<1x32xf32>
    %cst = arith.constant dense<0.000000e+00> : vector<16x96xf32>
    %11 = tpu.matmul %6, %7, %cst {dimension_numbers = #tpu.dot_dimension_numbers<[1], [0], [0], [1], [0, 0, 1, 1], [], []>} : vector<16x32xf32>, vector<32x96xf32>, vector<16x96xf32> -> vector<16x96xf32>
    %12 = vector.broadcast %9 : vector<1x96xf32> to vector<16x96xf32>
    %13 = arith.addf %11, %12 : vector<16x96xf32>
    %14 = vector.shape_cast %13 : vector<16x96xf32> to vector<2x8x96xf32>
    %cst_7 = arith.constant 0.000000e+00 : f32
    %15 = vector.broadcast %cst_7 : f32 to vector<16x32xf32>
    %16 = vector.extract_strided_slice %14 {offsets = [0, 0, 0], sizes = [2, 8, 8], strides = [1, 1, 1]} : vector<2x8x96xf32> to vector<2x8x8xf32>
    %17 = vector.extract_strided_slice %14 {offsets = [0, 0, 32], sizes = [2, 8, 8], strides = [1, 1, 1]} : vector<2x8x96xf32> to vector<2x8x8xf32>
    %18 = vector.extract_strided_slice %14 {offsets = [0, 0, 64], sizes = [2, 8, 8], strides = [1, 1, 1]} : vector<2x8x96xf32> to vector<2x8x8xf32>
    "tpu.trace_start"() <{level = 10 : i32, message = "bqd,bkd->bqk"}> : () -> ()
    %cst_8 = arith.constant dense<0.000000e+00> : vector<2x8x8xf32>
    %19 = tpu.matmul %16, %17, %cst_8 {dimension_numbers = #tpu.dot_dimension_numbers<[2], [2], [1], [1], [0, 0, 0, 1, 1, 1], [0], [0]>} : vector<2x8x8xf32>, vector<2x8x8xf32>, vector<2x8x8xf32> -> vector<2x8x8xf32>
    "tpu.trace_stop"() : () -> ()
    %cst_9 = arith.constant dense<0xFF800000> : vector<2x8xf32>
    %20 = vector.multi_reduction <maximumf>, %19, %cst_9 [2] : vector<2x8x8xf32> to vector<2x8xf32>
    %21 = vector.shape_cast %20 : vector<2x8xf32> to vector<2x8x1xf32>
    %22 = vector.broadcast %21 : vector<2x8x1xf32> to vector<2x8x8xf32>
    %23 = arith.subf %19, %22 : vector<2x8x8xf32>
    %24 = math.exp %23 : vector<2x8x8xf32>
    %cst_10 = arith.constant dense<0.000000e+00> : vector<2x8xf32>
    %25 = vector.multi_reduction <add>, %24, %cst_10 [2] : vector<2x8x8xf32> to vector<2x8xf32>
    %26 = vector.shape_cast %25 : vector<2x8xf32> to vector<2x8x1xf32>
    "tpu.trace_start"() <{level = 10 : i32, message = "bqk,bkd->bqd"}> : () -> ()
    %cst_11 = arith.constant dense<0.000000e+00> : vector<2x8x8xf32>
    %27 = tpu.matmul %24, %18, %cst_11 {dimension_numbers = #tpu.dot_dimension_numbers<[2], [1], [1], [2], [0, 0, 0, 1, 1, 2], [0], [0]>} : vector<2x8x8xf32>, vector<2x8x8xf32>, vector<2x8x8xf32> -> vector<2x8x8xf32>
    "tpu.trace_stop"() : () -> ()
    %28 = tpu.reciprocal %26 {approx = true} : vector<2x8x1xf32> -> vector<2x8x1xf32>
    %29 = vector.broadcast %28 : vector<2x8x1xf32> to vector<2x8x8xf32>
    %30 = arith.mulf %27, %29 : vector<2x8x8xf32>
    %31 = vector.shape_cast %30 : vector<2x8x8xf32> to vector<16x8xf32>
    %32 = vector.extract_strided_slice %8 {offsets = [0, 0], sizes = [8, 32], strides = [1, 1]} : vector<32x32xf32> to vector<8x32xf32>
    %cst_12 = arith.constant dense<0.000000e+00> : vector<16x32xf32>
    %33 = tpu.matmul %31, %32, %cst_12 {dimension_numbers = #tpu.dot_dimension_numbers<[1], [0], [0], [1], [0, 0, 1, 1], [], []>} : vector<16x8xf32>, vector<8x32xf32>, vector<16x32xf32> -> vector<16x32xf32>
    %34 = arith.addf %15, %33 : vector<16x32xf32>
    %35 = vector.extract_strided_slice %14 {offsets = [0, 0, 8], sizes = [2, 8, 8], strides = [1, 1, 1]} : vector<2x8x96xf32> to vector<2x8x8xf32>
    %36 = vector.extract_strided_slice %14 {offsets = [0, 0, 40], sizes = [2, 8, 8], strides = [1, 1, 1]} : vector<2x8x96xf32> to vector<2x8x8xf32>
    %37 = vector.extract_strided_slice %14 {offsets = [0, 0, 72], sizes = [2, 8, 8], strides = [1, 1, 1]} : vector<2x8x96xf32> to vector<2x8x8xf32>
    "tpu.trace_start"() <{level = 10 : i32, message = "bqd,bkd->bqk"}> : () -> ()
    %cst_13 = arith.constant dense<0.000000e+00> : vector<2x8x8xf32>
    %38 = tpu.matmul %35, %36, %cst_13 {dimension_numbers = #tpu.dot_dimension_numbers<[2], [2], [1], [1], [0, 0, 0, 1, 1, 1], [0], [0]>} : vector<2x8x8xf32>, vector<2x8x8xf32>, vector<2x8x8xf32> -> vector<2x8x8xf32>
    "tpu.trace_stop"() : () -> ()
    %cst_14 = arith.constant dense<0xFF800000> : vector<2x8xf32>
    %39 = vector.multi_reduction <maximumf>, %38, %cst_14 [2] : vector<2x8x8xf32> to vector<2x8xf32>
    %40 = vector.shape_cast %39 : vector<2x8xf32> to vector<2x8x1xf32>
    %41 = vector.broadcast %40 : vector<2x8x1xf32> to vector<2x8x8xf32>
    %42 = arith.subf %38, %41 : vector<2x8x8xf32>
    %43 = math.exp %42 : vector<2x8x8xf32>
    %cst_15 = arith.constant dense<0.000000e+00> : vector<2x8xf32>
    %44 = vector.multi_reduction <add>, %43, %cst_15 [2] : vector<2x8x8xf32> to vector<2x8xf32>
    %45 = vector.shape_cast %44 : vector<2x8xf32> to vector<2x8x1xf32>
    "tpu.trace_start"() <{level = 10 : i32, message = "bqk,bkd->bqd"}> : () -> ()
    %cst_16 = arith.constant dense<0.000000e+00> : vector<2x8x8xf32>
    %46 = tpu.matmul %43, %37, %cst_16 {dimension_numbers = #tpu.dot_dimension_numbers<[2], [1], [1], [2], [0, 0, 0, 1, 1, 2], [0], [0]>} : vector<2x8x8xf32>, vector<2x8x8xf32>, vector<2x8x8xf32> -> vector<2x8x8xf32>
    "tpu.trace_stop"() : () -> ()
    %47 = tpu.reciprocal %45 {approx = true} : vector<2x8x1xf32> -> vector<2x8x1xf32>
    %48 = vector.broadcast %47 : vector<2x8x1xf32> to vector<2x8x8xf32>
    %49 = arith.mulf %46, %48 : vector<2x8x8xf32>
    %50 = vector.shape_cast %49 : vector<2x8x8xf32> to vector<16x8xf32>
    %51 = vector.extract_strided_slice %8 {offsets = [8, 0], sizes = [8, 32], strides = [1, 1]} : vector<32x32xf32> to vector<8x32xf32>
    %cst_17 = arith.constant dense<0.000000e+00> : vector<16x32xf32>
    %52 = tpu.matmul %50, %51, %cst_17 {dimension_numbers = #tpu.dot_dimension_numbers<[1], [0], [0], [1], [0, 0, 1, 1], [], []>} : vector<16x8xf32>, vector<8x32xf32>, vector<16x32xf32> -> vector<16x32xf32>
    %53 = arith.addf %34, %52 : vector<16x32xf32>
    %54 = vector.extract_strided_slice %14 {offsets = [0, 0, 16], sizes = [2, 8, 8], strides = [1, 1, 1]} : vector<2x8x96xf32> to vector<2x8x8xf32>
    %55 = vector.extract_strided_slice %14 {offsets = [0, 0, 48], sizes = [2, 8, 8], strides = [1, 1, 1]} : vector<2x8x96xf32> to vector<2x8x8xf32>
    %56 = vector.extract_strided_slice %14 {offsets = [0, 0, 80], sizes = [2, 8, 8], strides = [1, 1, 1]} : vector<2x8x96xf32> to vector<2x8x8xf32>
    "tpu.trace_start"() <{level = 10 : i32, message = "bqd,bkd->bqk"}> : () -> ()
    %cst_18 = arith.constant dense<0.000000e+00> : vector<2x8x8xf32>
    %57 = tpu.matmul %54, %55, %cst_18 {dimension_numbers = #tpu.dot_dimension_numbers<[2], [2], [1], [1], [0, 0, 0, 1, 1, 1], [0], [0]>} : vector<2x8x8xf32>, vector<2x8x8xf32>, vector<2x8x8xf32> -> vector<2x8x8xf32>
    "tpu.trace_stop"() : () -> ()
    %cst_19 = arith.constant dense<0xFF800000> : vector<2x8xf32>
    %58 = vector.multi_reduction <maximumf>, %57, %cst_19 [2] : vector<2x8x8xf32> to vector<2x8xf32>
    %59 = vector.shape_cast %58 : vector<2x8xf32> to vector<2x8x1xf32>
    %60 = vector.broadcast %59 : vector<2x8x1xf32> to vector<2x8x8xf32>
    %61 = arith.subf %57, %60 : vector<2x8x8xf32>
    %62 = math.exp %61 : vector<2x8x8xf32>
    %cst_20 = arith.constant dense<0.000000e+00> : vector<2x8xf32>
    %63 = vector.multi_reduction <add>, %62, %cst_20 [2] : vector<2x8x8xf32> to vector<2x8xf32>
    %64 = vector.shape_cast %63 : vector<2x8xf32> to vector<2x8x1xf32>
    "tpu.trace_start"() <{level = 10 : i32, message = "bqk,bkd->bqd"}> : () -> ()
    %cst_21 = arith.constant dense<0.000000e+00> : vector<2x8x8xf32>
    %65 = tpu.matmul %62, %56, %cst_21 {dimension_numbers = #tpu.dot_dimension_numbers<[2], [1], [1], [2], [0, 0, 0, 1, 1, 2], [0], [0]>} : vector<2x8x8xf32>, vector<2x8x8xf32>, vector<2x8x8xf32> -> vector<2x8x8xf32>
    "tpu.trace_stop"() : () -> ()
    %66 = tpu.reciprocal %64 {approx = true} : vector<2x8x1xf32> -> vector<2x8x1xf32>
    %67 = vector.broadcast %66 : vector<2x8x1xf32> to vector<2x8x8xf32>
    %68 = arith.mulf %65, %67 : vector<2x8x8xf32>
    %69 = vector.shape_cast %68 : vector<2x8x8xf32> to vector<16x8xf32>
    %70 = vector.extract_strided_slice %8 {offsets = [16, 0], sizes = [8, 32], strides = [1, 1]} : vector<32x32xf32> to vector<8x32xf32>
    %cst_22 = arith.constant dense<0.000000e+00> : vector<16x32xf32>
    %71 = tpu.matmul %69, %70, %cst_22 {dimension_numbers = #tpu.dot_dimension_numbers<[1], [0], [0], [1], [0, 0, 1, 1], [], []>} : vector<16x8xf32>, vector<8x32xf32>, vector<16x32xf32> -> vector<16x32xf32>
    %72 = arith.addf %53, %71 : vector<16x32xf32>
    %73 = vector.extract_strided_slice %14 {offsets = [0, 0, 24], sizes = [2, 8, 8], strides = [1, 1, 1]} : vector<2x8x96xf32> to vector<2x8x8xf32>
    %74 = vector.extract_strided_slice %14 {offsets = [0, 0, 56], sizes = [2, 8, 8], strides = [1, 1, 1]} : vector<2x8x96xf32> to vector<2x8x8xf32>
    %75 = vector.extract_strided_slice %14 {offsets = [0, 0, 88], sizes = [2, 8, 8], strides = [1, 1, 1]} : vector<2x8x96xf32> to vector<2x8x8xf32>
    "tpu.trace_start"() <{level = 10 : i32, message = "bqd,bkd->bqk"}> : () -> ()
    %cst_23 = arith.constant dense<0.000000e+00> : vector<2x8x8xf32>
    %76 = tpu.matmul %73, %74, %cst_23 {dimension_numbers = #tpu.dot_dimension_numbers<[2], [2], [1], [1], [0, 0, 0, 1, 1, 1], [0], [0]>} : vector<2x8x8xf32>, vector<2x8x8xf32>, vector<2x8x8xf32> -> vector<2x8x8xf32>
    "tpu.trace_stop"() : () -> ()
    %cst_24 = arith.constant dense<0xFF800000> : vector<2x8xf32>
    %77 = vector.multi_reduction <maximumf>, %76, %cst_24 [2] : vector<2x8x8xf32> to vector<2x8xf32>
    %78 = vector.shape_cast %77 : vector<2x8xf32> to vector<2x8x1xf32>
    %79 = vector.broadcast %78 : vector<2x8x1xf32> to vector<2x8x8xf32>
    %80 = arith.subf %76, %79 : vector<2x8x8xf32>
    %81 = math.exp %80 : vector<2x8x8xf32>
    %cst_25 = arith.constant dense<0.000000e+00> : vector<2x8xf32>
    %82 = vector.multi_reduction <add>, %81, %cst_25 [2] : vector<2x8x8xf32> to vector<2x8xf32>
    %83 = vector.shape_cast %82 : vector<2x8xf32> to vector<2x8x1xf32>
    "tpu.trace_start"() <{level = 10 : i32, message = "bqk,bkd->bqd"}> : () -> ()
    %cst_26 = arith.constant dense<0.000000e+00> : vector<2x8x8xf32>
    %84 = tpu.matmul %81, %75, %cst_26 {dimension_numbers = #tpu.dot_dimension_numbers<[2], [1], [1], [2], [0, 0, 0, 1, 1, 2], [0], [0]>} : vector<2x8x8xf32>, vector<2x8x8xf32>, vector<2x8x8xf32> -> vector<2x8x8xf32>
    "tpu.trace_stop"() : () -> ()
    %85 = tpu.reciprocal %83 {approx = true} : vector<2x8x1xf32> -> vector<2x8x1xf32>
    %86 = vector.broadcast %85 : vector<2x8x1xf32> to vector<2x8x8xf32>
    %87 = arith.mulf %84, %86 : vector<2x8x8xf32>
    %88 = vector.shape_cast %87 : vector<2x8x8xf32> to vector<16x8xf32>
    %89 = vector.extract_strided_slice %8 {offsets = [24, 0], sizes = [8, 32], strides = [1, 1]} : vector<32x32xf32> to vector<8x32xf32>
    %cst_27 = arith.constant dense<0.000000e+00> : vector<16x32xf32>
    %90 = tpu.matmul %88, %89, %cst_27 {dimension_numbers = #tpu.dot_dimension_numbers<[1], [0], [0], [1], [0, 0, 1, 1], [], []>} : vector<16x8xf32>, vector<8x32xf32>, vector<16x32xf32> -> vector<16x32xf32>
    %91 = arith.addf %72, %90 : vector<16x32xf32>
    %92 = vector.broadcast %10 : vector<1x32xf32> to vector<16x32xf32>
    %93 = arith.addf %91, %92 : vector<16x32xf32>
    %94 = vector.shape_cast %93 : vector<16x32xf32> to vector<2x8x32xf32>
    %c0_28 = arith.constant 0 : index
    %c0_29 = arith.constant 0 : index
    %c0_30 = arith.constant 0 : index
    %95 = vector.load %arg2[%c0_28, %c0_29, %c0_30] : memref<2x32x32xf32, #tpu.memory_space<vmem>>, vector<2x32x32xf32>
    %96 = vector.extract_strided_slice %0 {offsets = [1, 0, 0], sizes = [1, 32, 128], strides = [1, 1, 1]} : vector<2x32x128xf32> to vector<1x32x128xf32>
    %97 = vector.shape_cast %96 : vector<1x32x128xf32> to vector<32x128xf32>
    %98 = vector.extract_strided_slice %1 {offsets = [1, 0], sizes = [1, 128], strides = [1, 1]} : vector<2x128xf32> to vector<1x128xf32>
    %99 = vector.shape_cast %95 : vector<2x32x32xf32> to vector<64x32xf32>
    %100 = vector.extract_strided_slice %97 {offsets = [0, 0], sizes = [32, 96], strides = [1, 1]} : vector<32x128xf32> to vector<32x96xf32>
    %101 = vector.extract_strided_slice %97 {offsets = [0, 96], sizes = [32, 32], strides = [1, 1]} : vector<32x128xf32> to vector<32x32xf32>
    %102 = vector.extract_strided_slice %98 {offsets = [0, 0], sizes = [1, 96], strides = [1, 1]} : vector<1x128xf32> to vector<1x96xf32>
    %103 = vector.extract_strided_slice %98 {offsets = [0, 96], sizes = [1, 32], strides = [1, 1]} : vector<1x128xf32> to vector<1x32xf32>
    %cst_31 = arith.constant dense<0.000000e+00> : vector<64x96xf32>
    %104 = tpu.matmul %99, %100, %cst_31 {dimension_numbers = #tpu.dot_dimension_numbers<[1], [0], [0], [1], [0, 0, 1, 1], [], []>} : vector<64x32xf32>, vector<32x96xf32>, vector<64x96xf32> -> vector<64x96xf32>
    %105 = vector.broadcast %102 : vector<1x96xf32> to vector<64x96xf32>
    %106 = arith.addf %104, %105 : vector<64x96xf32>
    %107 = vector.shape_cast %106 : vector<64x96xf32> to vector<2x32x96xf32>
    %cst_32 = arith.constant 0.000000e+00 : f32
    %108 = vector.broadcast %cst_32 : f32 to vector<64x32xf32>
    %109 = vector.extract_strided_slice %107 {offsets = [0, 0, 0], sizes = [2, 32, 8], strides = [1, 1, 1]} : vector<2x32x96xf32> to vector<2x32x8xf32>
    %110 = vector.extract_strided_slice %107 {offsets = [0, 0, 32], sizes = [2, 32, 8], strides = [1, 1, 1]} : vector<2x32x96xf32> to vector<2x32x8xf32>
    %111 = vector.extract_strided_slice %107 {offsets = [0, 0, 64], sizes = [2, 32, 8], strides = [1, 1, 1]} : vector<2x32x96xf32> to vector<2x32x8xf32>
    "tpu.trace_start"() <{level = 10 : i32, message = "bqd,bkd->bqk"}> : () -> ()
    %cst_33 = arith.constant dense<0.000000e+00> : vector<2x32x32xf32>
    %112 = tpu.matmul %109, %110, %cst_33 {dimension_numbers = #tpu.dot_dimension_numbers<[2], [2], [1], [1], [0, 0, 0, 1, 1, 1], [0], [0]>} : vector<2x32x8xf32>, vector<2x32x8xf32>, vector<2x32x32xf32> -> vector<2x32x32xf32>
    "tpu.trace_stop"() : () -> ()
    %cst_34 = arith.constant dense<0xFF800000> : vector<2x32xf32>
    %113 = vector.multi_reduction <maximumf>, %112, %cst_34 [2] : vector<2x32x32xf32> to vector<2x32xf32>
    %114 = vector.shape_cast %113 : vector<2x32xf32> to vector<2x32x1xf32>
    %115 = vector.broadcast %114 : vector<2x32x1xf32> to vector<2x32x32xf32>
    %116 = arith.subf %112, %115 : vector<2x32x32xf32>
    %117 = math.exp %116 : vector<2x32x32xf32>
    %cst_35 = arith.constant dense<0.000000e+00> : vector<2x32xf32>
    %118 = vector.multi_reduction <add>, %117, %cst_35 [2] : vector<2x32x32xf32> to vector<2x32xf32>
    %119 = vector.shape_cast %118 : vector<2x32xf32> to vector<2x32x1xf32>
    "tpu.trace_start"() <{level = 10 : i32, message = "bqk,bkd->bqd"}> : () -> ()
    %cst_36 = arith.constant dense<0.000000e+00> : vector<2x32x8xf32>
    %120 = tpu.matmul %117, %111, %cst_36 {dimension_numbers = #tpu.dot_dimension_numbers<[2], [1], [1], [2], [0, 0, 0, 1, 1, 2], [0], [0]>} : vector<2x32x32xf32>, vector<2x32x8xf32>, vector<2x32x8xf32> -> vector<2x32x8xf32>
    "tpu.trace_stop"() : () -> ()
    %121 = tpu.reciprocal %119 {approx = true} : vector<2x32x1xf32> -> vector<2x32x1xf32>
    %122 = vector.broadcast %121 : vector<2x32x1xf32> to vector<2x32x8xf32>
    %123 = arith.mulf %120, %122 : vector<2x32x8xf32>
    %124 = vector.shape_cast %123 : vector<2x32x8xf32> to vector<64x8xf32>
    %125 = vector.extract_strided_slice %101 {offsets = [0, 0], sizes = [8, 32], strides = [1, 1]} : vector<32x32xf32> to vector<8x32xf32>
    %cst_37 = arith.constant dense<0.000000e+00> : vector<64x32xf32>
    %126 = tpu.matmul %124, %125, %cst_37 {dimension_numbers = #tpu.dot_dimension_numbers<[1], [0], [0], [1], [0, 0, 1, 1], [], []>} : vector<64x8xf32>, vector<8x32xf32>, vector<64x32xf32> -> vector<64x32xf32>
    %127 = arith.addf %108, %126 : vector<64x32xf32>
    %128 = vector.extract_strided_slice %107 {offsets = [0, 0, 8], sizes = [2, 32, 8], strides = [1, 1, 1]} : vector<2x32x96xf32> to vector<2x32x8xf32>
    %129 = vector.extract_strided_slice %107 {offsets = [0, 0, 40], sizes = [2, 32, 8], strides = [1, 1, 1]} : vector<2x32x96xf32> to vector<2x32x8xf32>
    %130 = vector.extract_strided_slice %107 {offsets = [0, 0, 72], sizes = [2, 32, 8], strides = [1, 1, 1]} : vector<2x32x96xf32> to vector<2x32x8xf32>
    "tpu.trace_start"() <{level = 10 : i32, message = "bqd,bkd->bqk"}> : () -> ()
    %cst_38 = arith.constant dense<0.000000e+00> : vector<2x32x32xf32>
    %131 = tpu.matmul %128, %129, %cst_38 {dimension_numbers = #tpu.dot_dimension_numbers<[2], [2], [1], [1], [0, 0, 0, 1, 1, 1], [0], [0]>} : vector<2x32x8xf32>, vector<2x32x8xf32>, vector<2x32x32xf32> -> vector<2x32x32xf32>
    "tpu.trace_stop"() : () -> ()
    %cst_39 = arith.constant dense<0xFF800000> : vector<2x32xf32>
    %132 = vector.multi_reduction <maximumf>, %131, %cst_39 [2] : vector<2x32x32xf32> to vector<2x32xf32>
    %133 = vector.shape_cast %132 : vector<2x32xf32> to vector<2x32x1xf32>
    %134 = vector.broadcast %133 : vector<2x32x1xf32> to vector<2x32x32xf32>
    %135 = arith.subf %131, %134 : vector<2x32x32xf32>
    %136 = math.exp %135 : vector<2x32x32xf32>
    %cst_40 = arith.constant dense<0.000000e+00> : vector<2x32xf32>
    %137 = vector.multi_reduction <add>, %136, %cst_40 [2] : vector<2x32x32xf32> to vector<2x32xf32>
    %138 = vector.shape_cast %137 : vector<2x32xf32> to vector<2x32x1xf32>
    "tpu.trace_start"() <{level = 10 : i32, message = "bqk,bkd->bqd"}> : () -> ()
    %cst_41 = arith.constant dense<0.000000e+00> : vector<2x32x8xf32>
    %139 = tpu.matmul %136, %130, %cst_41 {dimension_numbers = #tpu.dot_dimension_numbers<[2], [1], [1], [2], [0, 0, 0, 1, 1, 2], [0], [0]>} : vector<2x32x32xf32>, vector<2x32x8xf32>, vector<2x32x8xf32> -> vector<2x32x8xf32>
    "tpu.trace_stop"() : () -> ()
    %140 = tpu.reciprocal %138 {approx = true} : vector<2x32x1xf32> -> vector<2x32x1xf32>
    %141 = vector.broadcast %140 : vector<2x32x1xf32> to vector<2x32x8xf32>
    %142 = arith.mulf %139, %141 : vector<2x32x8xf32>
    %143 = vector.shape_cast %142 : vector<2x32x8xf32> to vector<64x8xf32>
    %144 = vector.extract_strided_slice %101 {offsets = [8, 0], sizes = [8, 32], strides = [1, 1]} : vector<32x32xf32> to vector<8x32xf32>
    %cst_42 = arith.constant dense<0.000000e+00> : vector<64x32xf32>
    %145 = tpu.matmul %143, %144, %cst_42 {dimension_numbers = #tpu.dot_dimension_numbers<[1], [0], [0], [1], [0, 0, 1, 1], [], []>} : vector<64x8xf32>, vector<8x32xf32>, vector<64x32xf32> -> vector<64x32xf32>
    %146 = arith.addf %127, %145 : vector<64x32xf32>
    %147 = vector.extract_strided_slice %107 {offsets = [0, 0, 16], sizes = [2, 32, 8], strides = [1, 1, 1]} : vector<2x32x96xf32> to vector<2x32x8xf32>
    %148 = vector.extract_strided_slice %107 {offsets = [0, 0, 48], sizes = [2, 32, 8], strides = [1, 1, 1]} : vector<2x32x96xf32> to vector<2x32x8xf32>
    %149 = vector.extract_strided_slice %107 {offsets = [0, 0, 80], sizes = [2, 32, 8], strides = [1, 1, 1]} : vector<2x32x96xf32> to vector<2x32x8xf32>
    "tpu.trace_start"() <{level = 10 : i32, message = "bqd,bkd->bqk"}> : () -> ()
    %cst_43 = arith.constant dense<0.000000e+00> : vector<2x32x32xf32>
    %150 = tpu.matmul %147, %148, %cst_43 {dimension_numbers = #tpu.dot_dimension_numbers<[2], [2], [1], [1], [0, 0, 0, 1, 1, 1], [0], [0]>} : vector<2x32x8xf32>, vector<2x32x8xf32>, vector<2x32x32xf32> -> vector<2x32x32xf32>
    "tpu.trace_stop"() : () -> ()
    %cst_44 = arith.constant dense<0xFF800000> : vector<2x32xf32>
    %151 = vector.multi_reduction <maximumf>, %150, %cst_44 [2] : vector<2x32x32xf32> to vector<2x32xf32>
    %152 = vector.shape_cast %151 : vector<2x32xf32> to vector<2x32x1xf32>
    %153 = vector.broadcast %152 : vector<2x32x1xf32> to vector<2x32x32xf32>
    %154 = arith.subf %150, %153 : vector<2x32x32xf32>
    %155 = math.exp %154 : vector<2x32x32xf32>
    %cst_45 = arith.constant dense<0.000000e+00> : vector<2x32xf32>
    %156 = vector.multi_reduction <add>, %155, %cst_45 [2] : vector<2x32x32xf32> to vector<2x32xf32>
    %157 = vector.shape_cast %156 : vector<2x32xf32> to vector<2x32x1xf32>
    "tpu.trace_start"() <{level = 10 : i32, message = "bqk,bkd->bqd"}> : () -> ()
    %cst_46 = arith.constant dense<0.000000e+00> : vector<2x32x8xf32>
    %158 = tpu.matmul %155, %149, %cst_46 {dimension_numbers = #tpu.dot_dimension_numbers<[2], [1], [1], [2], [0, 0, 0, 1, 1, 2], [0], [0]>} : vector<2x32x32xf32>, vector<2x32x8xf32>, vector<2x32x8xf32> -> vector<2x32x8xf32>
    "tpu.trace_stop"() : () -> ()
    %159 = tpu.reciprocal %157 {approx = true} : vector<2x32x1xf32> -> vector<2x32x1xf32>
    %160 = vector.broadcast %159 : vector<2x32x1xf32> to vector<2x32x8xf32>
    %161 = arith.mulf %158, %160 : vector<2x32x8xf32>
    %162 = vector.shape_cast %161 : vector<2x32x8xf32> to vector<64x8xf32>
    %163 = vector.extract_strided_slice %101 {offsets = [16, 0], sizes = [8, 32], strides = [1, 1]} : vector<32x32xf32> to vector<8x32xf32>
    %cst_47 = arith.constant dense<0.000000e+00> : vector<64x32xf32>
    %164 = tpu.matmul %162, %163, %cst_47 {dimension_numbers = #tpu.dot_dimension_numbers<[1], [0], [0], [1], [0, 0, 1, 1], [], []>} : vector<64x8xf32>, vector<8x32xf32>, vector<64x32xf32> -> vector<64x32xf32>
    %165 = arith.addf %146, %164 : vector<64x32xf32>
    %166 = vector.extract_strided_slice %107 {offsets = [0, 0, 24], sizes = [2, 32, 8], strides = [1, 1, 1]} : vector<2x32x96xf32> to vector<2x32x8xf32>
    %167 = vector.extract_strided_slice %107 {offsets = [0, 0, 56], sizes = [2, 32, 8], strides = [1, 1, 1]} : vector<2x32x96xf32> to vector<2x32x8xf32>
    %168 = vector.extract_strided_slice %107 {offsets = [0, 0, 88], sizes = [2, 32, 8], strides = [1, 1, 1]} : vector<2x32x96xf32> to vector<2x32x8xf32>
    "tpu.trace_start"() <{level = 10 : i32, message = "bqd,bkd->bqk"}> : () -> ()
    %cst_48 = arith.constant dense<0.000000e+00> : vector<2x32x32xf32>
    %169 = tpu.matmul %166, %167, %cst_48 {dimension_numbers = #tpu.dot_dimension_numbers<[2], [2], [1], [1], [0, 0, 0, 1, 1, 1], [0], [0]>} : vector<2x32x8xf32>, vector<2x32x8xf32>, vector<2x32x32xf32> -> vector<2x32x32xf32>
    "tpu.trace_stop"() : () -> ()
    %cst_49 = arith.constant dense<0xFF800000> : vector<2x32xf32>
    %170 = vector.multi_reduction <maximumf>, %169, %cst_49 [2] : vector<2x32x32xf32> to vector<2x32xf32>
    %171 = vector.shape_cast %170 : vector<2x32xf32> to vector<2x32x1xf32>
    %172 = vector.broadcast %171 : vector<2x32x1xf32> to vector<2x32x32xf32>
    %173 = arith.subf %169, %172 : vector<2x32x32xf32>
    %174 = math.exp %173 : vector<2x32x32xf32>
    %cst_50 = arith.constant dense<0.000000e+00> : vector<2x32xf32>
    %175 = vector.multi_reduction <add>, %174, %cst_50 [2] : vector<2x32x32xf32> to vector<2x32xf32>
    %176 = vector.shape_cast %175 : vector<2x32xf32> to vector<2x32x1xf32>
    "tpu.trace_start"() <{level = 10 : i32, message = "bqk,bkd->bqd"}> : () -> ()
    %cst_51 = arith.constant dense<0.000000e+00> : vector<2x32x8xf32>
    %177 = tpu.matmul %174, %168, %cst_51 {dimension_numbers = #tpu.dot_dimension_numbers<[2], [1], [1], [2], [0, 0, 0, 1, 1, 2], [0], [0]>} : vector<2x32x32xf32>, vector<2x32x8xf32>, vector<2x32x8xf32> -> vector<2x32x8xf32>
    "tpu.trace_stop"() : () -> ()
    %178 = tpu.reciprocal %176 {approx = true} : vector<2x32x1xf32> -> vector<2x32x1xf32>
    %179 = vector.broadcast %178 : vector<2x32x1xf32> to vector<2x32x8xf32>
    %180 = arith.mulf %177, %179 : vector<2x32x8xf32>
    %181 = vector.shape_cast %180 : vector<2x32x8xf32> to vector<64x8xf32>
    %182 = vector.extract_strided_slice %101 {offsets = [24, 0], sizes = [8, 32], strides = [1, 1]} : vector<32x32xf32> to vector<8x32xf32>
    %cst_52 = arith.constant dense<0.000000e+00> : vector<64x32xf32>
    %183 = tpu.matmul %181, %182, %cst_52 {dimension_numbers = #tpu.dot_dimension_numbers<[1], [0], [0], [1], [0, 0, 1, 1], [], []>} : vector<64x8xf32>, vector<8x32xf32>, vector<64x32xf32> -> vector<64x32xf32>
    %184 = arith.addf %165, %183 : vector<64x32xf32>
    %185 = vector.broadcast %103 : vector<1x32xf32> to vector<64x32xf32>
    %186 = arith.addf %184, %185 : vector<64x32xf32>
    %187 = vector.shape_cast %186 : vector<64x32xf32> to vector<2x32x32xf32>
    %c0_53 = arith.constant 0 : index
    %c0_54 = arith.constant 0 : index
    %c0_55 = arith.constant 0 : index
    %188 = vector.load %arg5[%c0_53, %c0_54, %c0_55] : memref<1x32x1xf32, #tpu.memory_space<vmem>>, vector<1x32x1xf32>
    %189 = vector.broadcast %188 : vector<1x32x1xf32> to vector<2x32x32xf32>
    %190 = arith.mulf %187, %189 : vector<2x32x32xf32>
    %cst_56 = arith.constant dense<0.000000e+00> : vector<2x32xf32>
    %191 = vector.multi_reduction <add>, %190, %cst_56 [1] : vector<2x32x32xf32> to vector<2x32xf32>
    %192 = vector.shape_cast %191 : vector<2x32xf32> to vector<2x1x32xf32>
    %193 = vector.broadcast %192 : vector<2x1x32xf32> to vector<2x8x32xf32>
    %194 = arith.mulf %94, %193 : vector<2x8x32xf32>
    %cst_57 = arith.constant dense<0.000000e+00> : vector<2x8xf32>
    %195 = vector.multi_reduction <add>, %194, %cst_57 [2] : vector<2x8x32xf32> to vector<2x8xf32>
    %c0_58 = arith.constant 0 : index
    %196 = memref.load %arg6[%c0_58] : memref<1xf32, #tpu.memory_space<smem>>
    %197 = vector.broadcast %196 : f32 to vector<2x8xf32>
    %198 = arith.addf %195, %197 : vector<2x8xf32>
    %c0_59 = arith.constant 0 : index
    %c0_60 = arith.constant 0 : index
    %199 = vector.load %arg7[%c0_59, %c0_60] : memref<2x8xf32, #tpu.memory_space<vmem>>, vector<2x8xf32>
    tpu.vector_store %arg7[%c0_59, %c0_60], %198 {strides = array<i32>} : memref<2x8xf32, #tpu.memory_space<vmem>>, vector<2x8xf32>,
    return
  }
  func.func @transform_0(%arg0: i32) -> (i32, i32, i32) {
    %c0_i32 = arith.constant 0 : i32
    %c0_i32_0 = arith.constant 0 : i32
    %c0_i32_1 = arith.constant 0 : i32
    return %arg0, %c0_i32, %c0_i32_0 : i32, i32, i32
  }
  func.func @transform_1(%arg0: i32) -> (i32, i32, i32) {
    %c0_i32 = arith.constant 0 : i32
    %c0_i32_0 = arith.constant 0 : i32
    %c0_i32_1 = arith.constant 0 : i32
    return %arg0, %c0_i32, %c0_i32_0 : i32, i32, i32
  }
  func.func @transform_2(%arg0: i32) -> (i32, i32, i32) {
    %c0_i32 = arith.constant 0 : i32
    %c0_i32_0 = arith.constant 0 : i32
    %c0_i32_1 = arith.constant 0 : i32
    %c0_i32_2 = arith.constant 0 : i32
    return %c0_i32, %c0_i32_0, %c0_i32_1 : i32, i32, i32
  }
  func.func @transform_3(%arg0: i32) -> (i32, i32) {
    %c0_i32 = arith.constant 0 : i32
    %c0_i32_0 = arith.constant 0 : i32
    %c0_i32_1 = arith.constant 0 : i32
    return %c0_i32, %c0_i32_0 : i32, i32
  }
  func.func @transform_4(%arg0: i32) -> (i32, i32, i32) {
    %c0_i32 = arith.constant 0 : i32
    %c0_i32_0 = arith.constant 0 : i32
    %c0_i32_1 = arith.constant 0 : i32
    %c0_i32_2 = arith.constant 0 : i32
    return %c0_i32, %c0_i32_0, %c0_i32_1 : i32, i32, i32
  }
  func.func @transform_5(%arg0: i32) -> i32 {
    %c0_i32 = arith.constant 0 : i32
    %c0_i32_0 = arith.constant 0 : i32
    return %c0_i32 : i32
  }
  func.func @transform_6(%arg0: i32) -> (i32, i32) {
    %c0_i32 = arith.constant 0 : i32
    %c0_i32_0 = arith.constant 0 : i32
    return %arg0, %c0_i32 : i32, i32
  }
}

</mosaic_0001>

<bundles_post_ra>
// kernel: tpu_custom_call.1
= control target key start
LH: loop header
LB: loop body
LE: loop exit
PB: predicated region body
PF: predicated region fallthrough
CT: control target
= control target key end

     0   :  { %12 = vsyncpa [#allocation4], 0  ;;  %s7090_s0 = inlined_call_operand.vmem [shape: f32[2,8,32], index: 0, kind: input, shape index: {}]   ;;  %s7091_s1 = inlined_call_operand.hbm [shape: f32[2,32,32], index: 1, kind: input, shape index: {}]   ;;  %s7092_s2 = inlined_call_operand.hbm [shape: f32[2,32,128], index: 2, kind: input, shape index: {}]   ;;  %s7093_s3 = inlined_call_operand.vmem [shape: f32[2,128], index: 3, kind: input, shape index: {}]   ;;  %s7094_s4 = inlined_call_operand.vmem [shape: f32[1,32,1], index: 4, kind: input, shape index: {}]   ;;  %s7095_s5 = inlined_call_operand.<no memory space> [shape: f32[1], index: 5, kind: input, shape index: {}]   ;;  %s7096_s6 = inlined_call_operand.hbm [shape: f32[2,8], index: 6, kind: output, shape index: {}]  }
   0x1   :  { %13 = vsyncpa [#allocation7], 0 }
   0x2   :  { %14 = vsyncpa [#allocation5], 0  ;;  %s6204_s21 = smov [#allocation3]   ;;  %s6132_s25 = scalar_lea.hbm %s7091_s1, 1024 }
   0x3   :  { %s22_s22 = sshll.u32 %s6204_s21, 4  ;;  %p6133_p0 = scmp.ne.s32.totalorder %s7091_s1, %s6132_s25  ;;  %s23_s22 = int_to_ptr.vmem [resolvable:$true] %s22_s22 }
   0x4   :  { %p6136_p1 = scmp.lt.u32.totalorder %s6132_s25, %s7091_s1 }
   0x6   :  { %p6138_p2 = pnand %p6136_p1, %p6133_p0 }
   0x8   :  { %6141 = shalt.err (!%p6138_p2)
}
   0x9   :  { %s6142_s30 = scalar_lea.vmem %s23_s22, 1024  ;;  %p6147_p4 = scmp.lt.s32.totalorder %s23_s22, %s23_s22 }
   0xa   :  { %p6143_p3 = scmp.ne.s32.totalorder %s23_s22, %s6142_s30  ;;  %p6148_p5 = scmp.lt.s32.totalorder %s6142_s30, %s6142_s30 }
   0xc   :  { %p6149_p6 = por %p6148_p5, %p6147_p4 }
   0xe   :  { %p6150_p7 = pnand %p6149_p6, %p6143_p3 }
  0x10   :  { %6153 = shalt.err (!%p6150_p7)
}
  0x11   :  { %s6205_s7 = smov 128   ;;  %s6206_s8 = smov 8  }
  0x12   :  { %28 = dma.hbm_to_vmem [thread:$0]  %s7091_s1, 1024, %s23_s22, [#allocation4], %s6205_s7, %s6205_s7, %s6206_s8  }
  0x13   :  { %s6207_s11 = smov [#allocation6]   ;;  %s6154_s15 = scalar_lea.hbm %s7092_s2, 1024 }
  0x14   :  { %s34_s12 = sshll.u32 %s6207_s11, 4  ;;  %p6155_p8 = scmp.ne.s32.totalorder %s7092_s2, %s6154_s15  ;;  %s35_s12 = int_to_ptr.vmem [resolvable:$true] %s34_s12 }
  0x15   :  { %p6158_p9 = scmp.lt.u32.totalorder %s6154_s15, %s7092_s2 }
  0x17   :  { %p6160_p10 = pnand %p6158_p9, %p6155_p8 }
  0x19   :  { %6163 = shalt.err (!%p6160_p10)
}
  0x1a   :  { %s6164_s20 = scalar_lea.vmem %s35_s12, 1024  ;;  %p6169_p12 = scmp.lt.s32.totalorder %s35_s12, %s35_s12 }
  0x1b   :  { %p6165_p11 = scmp.ne.s32.totalorder %s35_s12, %s6164_s20  ;;  %p6170_p13 = scmp.lt.s32.totalorder %s6164_s20, %s6164_s20 }
  0x1d   :  { %p6171_p0 = por %p6170_p13, %p6169_p12 }
  0x1f   :  { %p6172_p1 = pnand %p6171_p0, %p6165_p11 }
  0x21   :  { %6175 = shalt.err (!%p6172_p1)
}
  0x22   :  { %40 = dma.hbm_to_vmem [thread:$0]  %s7092_s2, 1024, %s35_s12, [#allocation7], %s6205_s7, %s6205_s7, %s6206_s8  }
  0x23   :  { %6198 = dma.done.wait [#allocation4], 1024  }
  0x24   :  { %6199 = vsyncadd [#allocation4], 4294966272 }
  0x25   :  { %6200 = dma.done.wait [#allocation7], 1024  }
  0x26   :  { %6201 = vsyncadd [#allocation7], 4294966272  ;;  %vm68_vm0 = vcmask 261120   ;;  %v6283_v0 = vld [vmem:[#allocation6] sm:$0xff]  ;;  %v6285_v1 = vld [vmem:[#allocation6 + $0x8] sm:$0xff]  ;;  %v6208_v8 = vmov 0.0   ;;  %v64_v9 = vlaneseq }
  0x27   :  { %v6287_v2 = vld [vmem:[#allocation6 + $0x10] sm:$0xff]  ;;  %v5582_v3 = vpack.c.bf16 %v6285_v1, %v6283_v0  ;;  %v6291_v4 = vld [vmem:[#allocation6 + $0x18] sm:$0xff]  ;;  %v62_v5 = vld [vmem:[%s7090_s0] sm:$0xff]  ;;  %5182 = vmatprep.subr.mxu1 %v6208_v8  ;;  %vm6209_vm1 = vmmov 0   ;;  %s6210_s26 = smov 96   ;;  %s6212_s27 = smov 120  }
  0x28   :  { %v5586_v6 = vpack.c.bf16 %v6291_v4, %v6287_v2  ;;  %5179 = vmatprep.mubr.msk.f32.mxu0 %vm68_vm0, %v62_v5  ;;  %v63_v7 = vld [vmem:[%s7090_s0 + $0x8] sm:$0xff]  ;;  %v6306_v10 = vshrl.u32 %v64_v9, 7  ;;  %5184 = vmatprep.mubr.msk.f32.mxu1 %vm6209_vm1, %v6208_v8  ;;  %v6316_v12 = vld [vmem:[%s7093_s3] sm:$0x3]  ;;  %s6211_s3 = smov 88   ;;  %vm153_vm2 = vcmask 64512  }
  0x29   :  { %5583 = vmatprep.subr.bf16.mxu0 %v5582_v3  ;;  %s6213_s28 = smov 64   ;;  %s6214_s29 = smov 56   ;;  %vm6556_vm3 = vmpackc.low %vm153_vm2, %vm153_vm2  ;;  %vm4754_vm4 = vcmask 1041409   ;;  %vm4757_vm5 = vcmask 58368  }
  0x2a   :  { %5585 = vmatpush3.bf16.msra.mxu0 %v5582_v3  ;;  %v66_v11 = vsub.s32 0, %v6306_v10  ;;  %s6215_s30 = smov 80   ;;  %s6216_s7 = smov 112  }
  0x2b   :  { %5587 = vmatprep.subr.bf16.mxu0 %v5586_v6  ;;  %s6217_s8 = smov 32   ;;  %s6218_s9 = smov 48  }
  0x2c   :  { %v6319_v13 = vrot.slane %v6316_v12, %v66_v11  ;;  %s6219_s10 = smov 72   ;;  %s6220_s11 = smov 104  }
  0x2d   :  { %s6221_s12 = smov 40   ;;  %s6223_s21 = smov [#allocation8]  }
  0x2e   :  { %5589 = vmatpush3.bf16.msra.mxu0 %v5586_v6  ;;  %s4765_s22 = sshll.u32 %s6223_s21, 4  ;;  %s4766_s22 = int_to_ptr.vmem [resolvable:$true] %s4765_s22 }
  0x2f   :  { %5192 = vmatprep.subr.mxu0 %v6208_v8  ;;  %s6176_s23 = scalar_lea.vmem %s4766_s22, 32  ;;  %p6181_p3 = scmp.lt.s32.totalorder %s4766_s22, %s4766_s22 }
  0x30   :  { %p6177_p2 = scmp.ne.s32.totalorder %s4766_s22, %s6176_s23  ;;  %p6182_p4 = scmp.lt.s32.totalorder %s6176_s23, %s6176_s23 }
  0x31   :  { %5180 = vmatmul.mubr.msk.f32.vlgmr.msra.gmra.mrb[0].mxu0 %vm68_vm0, %v63_v7 }
  0x32   :  { %5194 = vmatprep.mubr.msk.f32.mxu0 %vm6209_vm1, %v6208_v8  ;;  %p6183_p5 = por %p6182_p4, %p6181_p3 }
  0x34   :  { %p6184_p6 = pnand %p6183_p5, %p6177_p2 }
 0x104   :  { %v5181_v14 = vpop.f32.mrb[0].mxu0 }
 0x105   :  { %v141_v15 = vpop.f32.mrb[1].mxu0  ;;  %v6327_v17 = vadd.f32 %v5181_v14, %v6319_v13 }
 0x106   :  { %v6322_v16 = vadd.f32 %v141_v15, %v6319_v13 }
 0x108   :  { %151 = vrot.lane.b32.xlu0 %v6322_v16, %s6210_s26 }
 0x10c   :  { %229 = vrot.lane.b32.xlu0 %v6327_v17, %s6210_s26 }
 0x110   :  { %559 = vrot.lane.b32.xlu0 %v6327_v17, %s6211_s3 }
 0x114   :  { %557 = vrot.lane.b32.xlu0 %v6327_v17, %s6212_s27 }
 0x17a   :  { %v152_v18 = vpop.permute.xlu0 %151 }
 0x17b   :  { %5183 = vmatpush3.xpose.msk.msra.mxu1 %vm153_vm2, %v152_v18 }
 0x17c   :  { %5187 = vmatprep.subr.mxu1 %v6208_v8 }
 0x17e   :  { %5185 = vmatmul.mubr.msk.f32.vlgmr.msra.gmra.mrb[0].mxu1 %vm153_vm2, %v6322_v16  ;;  %v230_v19 = vpop.permute.xlu0 %229 }
 0x17f   :  { %5188 = vmatpush3.xpose.msk.msra.mxu1 %vm153_vm2, %v230_v19  ;;  %5189 = vmatprep.mubr.msk.f32.mxu1 %vm6209_vm1, %v6208_v8 }
 0x180   :  { %5197 = vmatprep.subr.mxu1 %v6208_v8 }
 0x182   :  { %5190 = vmatmul.mubr.msk.f32.vlgmr.msra.gmra.mrb[2].mxu1 %vm153_vm2, %v6327_v17  ;;  %v560_v26 = vpop.permute.xlu0 %559 }
 0x183   :  { %5199 = vmatprep.mubr.msk.f32.mxu1 %vm6209_vm1, %v6208_v8 }
 0x186   :  { %v558_v27 = vpop.permute.xlu0 %557 }
 0x251   :  { %v224_v20 = vpop.f32.mrb[0].mxu1 }
 0x252   :  { %v5186_v21 = vpop.f32.mrb[1].mxu1  ;;  %v305_v22 = vsel %vm153_vm2, %v224_v20, -inf }
 0x253   :  { %306 = vmax.xlane.f32.xlu0 %v305_v22 }
 0x255   :  { %v301_v23 = vpop.f32.mrb[2].mxu1 }
 0x256   :  { %v5191_v24 = vpop.f32.mrb[3].mxu1  ;;  %v308_v25 = vsel %vm153_vm2, %v301_v23, -inf }
 0x257   :  { %309 = vmax.xlane.f32.xlu1 %v308_v25 }
 0x268   :  { %399 = vrot.lane.b32.xlu1 %v6327_v17, %s6213_s28 }
 0x269   :  { %729 = vrot.lane.b32.xlu0 %v6327_v17, %s6214_s29 }
 0x26c   :  { %323 = vrot.lane.b32.xlu1 %v6322_v16, %s6213_s28 }
 0x26d   :  { %981 = vrot.lane.b32.xlu0 %v6322_v16, %s6215_s30 }
 0x270   :  { %481 = vrot.lane.b32.xlu1 %v6322_v16, %s6211_s3 }
 0x271   :  { %1059 = vrot.lane.b32.xlu0 %v6327_v17, %s6215_s30 }
 0x274   :  { %479 = vrot.lane.b32.xlu1 %v6322_v16, %s6212_s27 }
 0x275   :  { %1057 = vrot.lane.b32.xlu0 %v6327_v17, %s6216_s7 }
 0x2e0   :  { %v307_v28 = vpop.xlane.xlu0 %306 }
 0x2e1   :  { %v311_v29 = vsub.f32 %v224_v20, %v307_v28 }
 0x2e3   :  { %v313_v30 = vmul.f32 1.442695, %v311_v29 }
 0x2e4   :  { %v310_v31 = vpop.xlane.xlu1 %309  ;;  %v730_v40 = vpop.permute.xlu0 %729 }
 0x2e5   :  { %5970 = vpow2.f32 %v313_v30  ;;  %v312_v32 = vsub.f32 %v301_v23, %v310_v31 }
 0x2e7   :  { %v315_v33 = vmul.f32 1.442695, %v312_v32 }
 0x2e8   :  { %v400_v34 = vpop.permute.xlu1 %399  ;;  %v982_v53 = vpop.permute.xlu0 %981 }
 0x2e9   :  { %5972 = vpow2.f32 %v315_v33  ;;  %5198 = vmatpush3.msra.mxu1 %v400_v34 }
 0x2ea   :  { %5207 = vmatprep.subr.mxu1 %v6208_v8 }
 0x2ec   :  { %v324_v35 = vpop.permute.xlu1 %323  ;;  %v1060_v54 = vpop.permute.xlu0 %1059 }
 0x2ed   :  { %5193 = vmatpush3.msra.mxu0 %v324_v35 }
 0x2ee   :  { %5202 = vmatprep.subr.mxu0 %v6208_v8 }
 0x2ef   :  { %v5971_v36 = vpop.eup %5970 }
 0x2f0   :  { %v482_v37 = vpop.permute.xlu1 %481  ;;  %5195 = vmatmul.mubr.msk.f32.vlgmr.msra.gmra.mrb[2].mxu0 %vm153_vm2, %v5971_v36  ;;  %v317_v51 = vsel %vm153_vm2, %v5971_v36, 0.0  ;;  %v1058_v55 = vpop.permute.xlu0 %1057 }
 0x2f1   :  { %5204 = vmatprep.mubr.msk.f32.mxu0 %vm6209_vm1, %v6208_v8 }
 0x2f3   :  { %v5973_v38 = vpop.eup %5972 }
 0x2f4   :  { %5200 = vmatmul.mubr.msk.f32.vlgmr.msra.gmra.mrb[4].mxu1 %vm153_vm2, %v5973_v38  ;;  %5203 = vmatpush3.xpose.msk.msra.mxu0 %vm153_vm2, %v482_v37  ;;  %v480_v39 = vpop.permute.xlu1 %479  ;;  %v320_v52 = vsel %vm153_vm2, %v5973_v38, 0.0 }
 0x2f5   :  { %5208 = vmatpush3.xpose.msk.msra.mxu1 %vm153_vm2, %v560_v26  ;;  %5209 = vmatprep.mubr.msk.f32.mxu1 %vm6209_vm1, %v6208_v8 }
 0x2f6   :  { %5217 = vmatprep.subr.mxu1 %v6208_v8  ;;  %5212 = vmatprep.subr.mxu0 %v6208_v8 }
 0x2f7   :  { %5205 = vmatmul.mubr.msk.f32.vlgmr.msra.gmra.mrb[4].mxu0 %vm153_vm2, %v480_v39 }
 0x2f8   :  { %5210 = vmatmul.mubr.msk.f32.vlgmr.msra.gmra.mrb[6].mxu1 %vm153_vm2, %v558_v27  ;;  %5214 = vmatprep.mubr.msk.f32.mxu0 %vm6209_vm1, %v6208_v8 }
 0x2f9   :  { %5218 = vmatpush3.msra.mxu1 %v730_v40  ;;  %5219 = vmatprep.mubr.msk.f32.mxu1 %vm6209_vm1, %v6208_v8 }
 0x2fa   :  { %5232 = vmatprep.subr.mxu1 %v6208_v8 }
 0x3c3   :  { %v6384_v41 = vpop.f32.mrb[2].mxu0 }
 0x3c4   :  { %v5196_v42 = vpop.f32.mrb[3].mxu0 }
 0x3c7   :  { %v6386_v43 = vpop.f32.mrb[4].mxu1 }
 0x3c8   :  { %v5201_v44 = vpop.f32.mrb[5].mxu1 }
 0x3ca   :  { %v553_v45 = vpop.f32.mrb[4].mxu0 }
 0x3cb   :  { %v5206_v46 = vpop.f32.mrb[5].mxu0  ;;  %v631_v47 = vpop.f32.mrb[6].mxu1  ;;  %v635_v48 = vsel %vm153_vm2, %v553_v45, -inf }
 0x3cc   :  { %v5211_v49 = vpop.f32.mrb[7].mxu1  ;;  %636 = vmax.xlane.f32.xlu0 %v635_v48  ;;  %v638_v50 = vsel %vm153_vm2, %v631_v47, -inf }
 0x3cd   :  { %639 = vmax.xlane.f32.xlu1 %v638_v50 }
 0x3d0   :  { %318 = vadd.xlane.f32.xlu0 %v317_v51 }
 0x3d4   :  { %321 = vadd.xlane.f32.xlu0 %v320_v52 }
 0x3de   :  { %979 = vrot.lane.b32.xlu1 %v6322_v16, %s6216_s7 }
 0x3e2   :  { %653 = vrot.lane.b32.xlu1 %v6322_v16, %s6214_s29 }
 0x459   :  { %v637_v56 = vpop.xlane.xlu0 %636 }
 0x45a   :  { %v641_v57 = vsub.f32 %v553_v45, %v637_v56  ;;  %v640_v58 = vpop.xlane.xlu1 %639 }
 0x45b   :  { %v642_v59 = vsub.f32 %v631_v47, %v640_v58 }
 0x45c   :  { %v643_v60 = vmul.f32 1.442695, %v641_v57 }
 0x45d   :  { %v645_v61 = vmul.f32 1.442695, %v642_v59  ;;  %v319_v11 = vpop.xlane.xlu0 %318 }
 0x45e   :  { %5974 = vpow2.f32 %v643_v60  ;;  %v980_v62 = vpop.permute.xlu1 %979 }
 0x45f   :  { %5976 = vpow2.f32 %v645_v61 }
 0x460   :  { %5978 = vrcp.f32 %v319_v11 }
 0x461   :  { %v322_v14 = vpop.xlane.xlu0 %321 }
 0x462   :  { %v654_v63 = vpop.permute.xlu1 %653 }
 0x463   :  { %5213 = vmatpush3.msra.mxu0 %v654_v63 }
 0x468   :  { %v5975_v3 = vpop.eup %5974 }
 0x469   :  { %v5977_v5 = vpop.eup %5976  ;;  %5215 = vmatmul.mubr.msk.f32.vlgmr.msra.gmra.mrb[6].mxu0 %vm153_vm2, %v5975_v3  ;;  %v647_v6 = vsel %vm153_vm2, %v5975_v3, 0.0 }
 0x46a   :  { %5220 = vmatmul.mubr.msk.f32.vlgmr.msra.gmra.mrb[8].mxu1 %vm153_vm2, %v5977_v5  ;;  %648 = vadd.xlane.f32.xlu1 %v647_v6  ;;  %v650_v7 = vsel %vm153_vm2, %v5977_v5, 0.0  ;;  %v5979_v21 = vpop.eup %5978  ;;  %v6466_v6 = vld [vmem:[#allocation6 + $0x20] sm:$0xff] }
 0x46b   :  { %5233 = vmatpush3.xpose.msk.msra.mxu1 %vm153_vm2, %v982_v53  ;;  %651 = vadd.xlane.f32.xlu0 %v650_v7  ;;  %v477_v28 = vmul.f32 %v5979_v21, %v6384_v41  ;;  %v6468_v7 = vld [vmem:[#allocation6 + $0x28] sm:$0xff]  ;;  %v60_v21 = vld [vmem:[#allocation6 + $0x38] sm:$0xff] }
 0x46c   :  { %5234 = vmatprep.mubr.msk.f32.mxu1 %vm6209_vm1, %v6208_v8  ;;  %5237 = vmatprep.subr.mxu1 %v6208_v8  ;;  %v5590_v11 = vpack.c.bf16 %v6468_v7, %v6466_v6 }
 0x46e   :  { %5235 = vmatmul.mubr.msk.f32.vlgmr.msra.gmra.mrb[10].mxu1 %vm153_vm2, %v980_v62 }
 0x46f   :  { %5238 = vmatpush3.xpose.msk.msra.mxu1 %vm153_vm2, %v1060_v54  ;;  %5239 = vmatprep.mubr.msk.f32.mxu1 %vm6209_vm1, %v6208_v8 }
 0x470   :  { %5247 = vmatprep.subr.mxu1 %v6208_v8 }
 0x472   :  { %5240 = vmatmul.mubr.msk.f32.vlgmr.msra.gmra.mrb[12].mxu1 %vm153_vm2, %v1058_v55 }
 0x473   :  { %5249 = vmatprep.mubr.msk.f32.mxu1 %vm6209_vm1, %v6208_v8 }
 0x47b   :  { %895 = vrot.lane.b32.xlu1 %v6283_v0, %s6217_s8 }
 0x481   :  { %810 = vrot.lane.b32.xlu0 %v6285_v1, %s6217_s8 }
 0x4f7   :  { %v649_v15 = vpop.xlane.xlu1 %648 }
 0x4f8   :  { %v652_v18 = vpop.xlane.xlu0 %651  ;;  %5980 = vrcp.f32 %v649_v15 }
 0x4f9   :  { %5982 = vrcp.f32 %v652_v18 }
 0x4fa   :  { %5984 = vrcp.f32 %v322_v14 }
 0x4fb   :  { %v896_v20 = vpop.permute.xlu1 %895 }
 0x4fc   :  { %v811_v19 = vpop.permute.xlu0 %810 }
 0x4fd   :  { %5222 = vmatprep.subr.mxu0 %v811_v19 }
 0x4fe   :  { %5223 = vmatpush3.msra.mxu0 %v811_v19 }
 0x4ff   :  { %5227 = vmatprep.subr.mxu0 %v896_v20 }
 0x502   :  { %v5981_v22 = vpop.eup %5980 }
 0x503   :  { %v5983_v0 = vpop.eup %5982 }
 0x504   :  { %v5985_v32 = vpop.eup %5984 }
 0x505   :  { %v478_v36 = vmul.f32 %v5985_v32, %v6386_v43 }
 0x53c   :  { %v725_v23 = vpop.f32.mrb[6].mxu0 }
 0x53d   :  { %v807_v24 = vmul.f32 %v5981_v22, %v725_v23  ;;  %v5216_v25 = vpop.f32.mrb[7].mxu0  ;;  %v801_v1 = vpop.f32.mrb[8].mxu1  ;;  %v1819_v22 = vld [vmem:[#allocation3] sm:$0xff] }
 0x53e   :  { %v808_v26 = vmul.f32 %v5983_v0, %v801_v1  ;;  %v5221_v27 = vpop.f32.mrb[9].mxu1  ;;  %v1820_v0 = vld [vmem:[#allocation3 + $0x8] sm:$0xff]  ;;  %v1823_v25 = vld [vmem:[#allocation3 + $0x20] sm:$0xff] }
 0x53f   :  { %5224 = vmatprep.mubr.msk.f32.mxu0 %vm153_vm2, %v807_v24  ;;  %v1822_v24 = vld [vmem:[#allocation3 + $0x18] sm:$0xff]  ;;  %v1824_v1 = vld [vmem:[#allocation3 + $0x28] sm:$0xff] }
 0x540   :  { %5225 = vmatmul.mubr.msk.f32.vlgmr.msra.gmra.mrb[8].mxu0 %vm153_vm2, %v808_v26  ;;  %v1825_v26 = vld [vmem:[#allocation3 + $0x30] sm:$0xff]  ;;  %v1826_v27 = vld [vmem:[#allocation3 + $0x38] sm:$0xff] }
 0x541   :  { %5229 = vmatprep.mubr.msk.f32.mxu0 %vm153_vm2, %v477_v28  ;;  %v1053_v29 = vpop.f32.mrb[10].mxu1  ;;  %5228 = vmatpush3.msra.mxu0 %v896_v20  ;;  %v59_v20 = vld [vmem:[#allocation6 + $0x30] sm:$0xff] }
 0x542   :  { %v5236_v30 = vpop.f32.mrb[11].mxu1  ;;  %v1135_v31 = vsel %vm153_vm2, %v1053_v29, -inf  ;;  %5242 = vmatprep.subr.mxu0 %v6208_v8 }
 0x543   :  { %1136 = vmax.xlane.f32.xlu0 %v1135_v31 }
 0x545   :  { %v1131_v33 = vpop.f32.mrb[12].mxu1 }
 0x546   :  { %v5241_v34 = vpop.f32.mrb[13].mxu1  ;;  %v1138_v35 = vsel %vm153_vm2, %v1131_v33, -inf }
 0x547   :  { %1139 = vmax.xlane.f32.xlu1 %v1138_v35 }
 0x548   :  { %5230 = vmatmul.mubr.msk.f32.vlgmr.msra.gmra.mrb[8].mxu0 %vm153_vm2, %v478_v36 }
 0x549   :  { %5244 = vmatprep.mubr.msk.f32.mxu0 %vm6209_vm1, %v6208_v8 }
 0x558   :  { %1153 = vrot.lane.b32.xlu1 %v6322_v16, %s6218_s9 }
 0x559   :  { %1229 = vrot.lane.b32.xlu0 %v6327_v17, %s6218_s9 }
 0x55c   :  { %1398 = vrot.lane.b32.xlu1 %v6322_v16, %s6219_s10 }
 0x55d   :  { %1396 = vrot.lane.b32.xlu0 %v6322_v16, %s6220_s11 }
 0x5d0   :  { %v1137_v37 = vpop.xlane.xlu0 %1136 }
 0x5d1   :  { %v1141_v38 = vsub.f32 %v1053_v29, %v1137_v37  ;;  %v1829_v37 = vsub.s32 1, %v6306_v10 }
 0x5d3   :  { %v1143_v39 = vmul.f32 1.442695, %v1141_v38 }
 0x5d4   :  { %v1140_v40 = vpop.xlane.xlu1 %1139  ;;  %v1230_v41 = vpop.permute.xlu0 %1229 }
 0x5d5   :  { %5986 = vpow2.f32 %v1143_v39  ;;  %v1142_v42 = vsub.f32 %v1131_v33, %v1140_v40  ;;  %5248 = vmatpush3.msra.mxu1 %v1230_v41 }
 0x5d6   :  { %5257 = vmatprep.subr.mxu1 %v6208_v8 }
 0x5d7   :  { %v1145_v43 = vmul.f32 1.442695, %v1142_v42 }
 0x5d8   :  { %v1154_v44 = vpop.permute.xlu1 %1153  ;;  %v1397_v50 = vpop.permute.xlu0 %1396 }
 0x5d9   :  { %5988 = vpow2.f32 %v1145_v43  ;;  %5243 = vmatpush3.msra.mxu0 %v1154_v44  ;;  %v6489_v43 = vrot.slane %v6316_v12, %v1829_v37 }
 0x5dc   :  { %v1399_v48 = vpop.permute.xlu1 %1398 }
 0x5df   :  { %v5987_v45 = vpop.eup %5986 }
 0x5e0   :  { %5245 = vmatmul.mubr.msk.f32.vlgmr.msra.gmra.mrb[10].mxu0 %vm153_vm2, %v5987_v45  ;;  %v1147_v46 = vsel %vm153_vm2, %v5987_v45, 0.0 }
 0x5e1   :  { %1148 = vadd.xlane.f32.xlu1 %v1147_v46 }
 0x5e3   :  { %v5989_v47 = vpop.eup %5988 }
 0x5e4   :  { %5250 = vmatmul.mubr.msk.f32.vlgmr.msra.gmra.mrb[14].mxu1 %vm153_vm2, %v5989_v47  ;;  %v1150_v49 = vsel %vm153_vm2, %v5989_v47, 0.0 }
 0x5e5   :  { %5258 = vmatpush3.xpose.msk.msra.mxu1 %vm153_vm2, %v1399_v48  ;;  %1151 = vadd.xlane.f32.xlu0 %v1150_v49 }
 0x5e6   :  { %5259 = vmatprep.mubr.msk.f32.mxu1 %vm6209_vm1, %v6208_v8  ;;  %5267 = vmatprep.subr.mxu1 %v6208_v8 }
 0x5e8   :  { %5260 = vmatmul.mubr.msk.f32.vlgmr.msra.gmra.mrb[16].mxu1 %vm153_vm2, %v1397_v50 }
 0x5e9   :  { %5269 = vmatprep.mubr.msk.f32.mxu1 %vm6209_vm1, %v6208_v8 }
 0x5f2   :  { %1476 = vrot.lane.b32.xlu1 %v6327_v17, %s6219_s10 }
 0x5f6   :  { %1474 = vrot.lane.b32.xlu1 %v6327_v17, %s6220_s11 }
 0x5fa   :  { %1570 = vrot.lane.b32.xlu1 %v6322_v16, %s6221_s12 }
 0x5fb   :  { %1310 = vrot.lane.b32.xlu0 %v6287_v2, %s6217_s8 }
 0x66e   :  { %v1149_v51 = vpop.xlane.xlu1 %1148 }
 0x66f   :  { %5990 = vrcp.f32 %v1149_v51 }
 0x672   :  { %v1477_v52 = vpop.permute.xlu1 %1476  ;;  %v1152_v53 = vpop.xlane.xlu0 %1151 }
 0x673   :  { %5992 = vrcp.f32 %v1152_v53 }
 0x676   :  { %v1475_v54 = vpop.permute.xlu1 %1474  ;;  %v1311_v55 = vpop.permute.xlu0 %1310 }
 0x677   :  { %5252 = vmatprep.subr.mxu0 %v1311_v55 }
 0x678   :  { %5253 = vmatpush3.msra.mxu0 %v1311_v55 }
 0x679   :  { %5262 = vmatprep.subr.mxu0 %v6208_v8  ;;  %v5991_v57 = vpop.eup %5990 }
 0x67a   :  { %v1571_v56 = vpop.permute.xlu1 %1570 }
 0x67b   :  { %5268 = vmatpush3.msra.mxu1 %v1571_v56 }
 0x67c   :  { %5591 = vmatprep.subr.bf16.mxu1 %v5590_v11 }
 0x67d   :  { %v5993_v2 = vpop.eup %5992 }
 0x6b3   :  { %v1225_v58 = vpop.f32.mrb[10].mxu0 }
 0x6b4   :  { %v1307_v59 = vmul.f32 %v5991_v57, %v1225_v58  ;;  %v5246_v16 = vpop.f32.mrb[11].mxu0 }
 0x6b6   :  { %5254 = vmatprep.mubr.msk.f32.mxu0 %vm153_vm2, %v1307_v59 }
 0x6b7   :  { %v1301_v60 = vpop.f32.mrb[14].mxu1 }
 0x6b8   :  { %v1308_v61 = vmul.f32 %v5993_v2, %v1301_v60  ;;  %v5251_v62 = vpop.f32.mrb[15].mxu1 }
 0x6ba   :  { %5255 = vmatmul.mubr.msk.f32.vlgmr.msra.gmra.mrb[8].mxu0 %vm153_vm2, %v1308_v61 }
 0x6bb   :  { %5263 = vmatpush3.xpose.msk.msra.mxu0 %vm153_vm2, %v1477_v52  ;;  %v1470_v63 = vpop.f32.mrb[16].mxu1  ;;  %5264 = vmatprep.mubr.msk.f32.mxu0 %vm6209_vm1, %v6208_v8 }
 0x6bc   :  { %v5261_v3 = vpop.f32.mrb[17].mxu1  ;;  %v1552_v5 = vsel %vm153_vm2, %v1470_v63, -inf  ;;  %5272 = vmatprep.subr.mxu0 %v6208_v8 }
 0x6bd   :  { %1553 = vmax.xlane.f32.xlu0 %v1552_v5 }
 0x6be   :  { %5265 = vmatmul.mubr.msk.f32.vlgmr.msra.gmra.mrb[12].mxu0 %vm153_vm2, %v1475_v54 }
 0x6bf   :  { %5274 = vmatprep.mubr.msk.f32.mxu0 %vm6209_vm1, %v6208_v8  ;;  %v5594_v8 = vpack.c.bf16 %v60_v21, %v59_v20 }
 0x6d3   :  { %1646 = vrot.lane.b32.xlu0 %v6327_v17, %s6221_s12  ;;  %v1821_v17 = vld [vmem:[#allocation3 + $0x10] sm:$0xff] }
 0x74a   :  { %v1554_v14 = vpop.xlane.xlu0 %1553 }
 0x74b   :  { %v1558_v15 = vsub.f32 %v1470_v63, %v1554_v14 }
 0x74d   :  { %v1560_v18 = vmul.f32 1.442695, %v1558_v15 }
 0x74e   :  { %v1647_v19 = vpop.permute.xlu0 %1646 }
 0x74f   :  { %5994 = vpow2.f32 %v1560_v18  ;;  %5273 = vmatpush3.msra.mxu0 %v1647_v19 }
 0x759   :  { %v5995_v23 = vpop.eup %5994 }
 0x75a   :  { %5270 = vmatmul.mubr.msk.f32.vlgmr.msra.gmra.mrb[18].mxu1 %vm153_vm2, %v5995_v23  ;;  %v1564_v31 = vsel %vm153_vm2, %v5995_v23, 0.0 }
 0x75b   :  { %5593 = vmatpush3.bf16.msra.mxu1 %v5590_v11  ;;  %5290 = vmatprep.mubr.msk.f32.mxu1 %vm68_vm0, %v1819_v22 }
 0x75c   :  { %5595 = vmatprep.subr.bf16.mxu1 %v5594_v8 }
 0x75f   :  { %5597 = vmatpush3.bf16.msra.mxu1 %v5594_v8 }
 0x762   :  { %5291 = vmatmul.mubr.msk.f32.vlgmr.msra.gmra.mrb[20].mxu1 %vm68_vm0, %v1820_v0 }
 0x763   :  { %5293 = vmatprep.mubr.msk.f32.mxu1 %vm68_vm0, %v1821_v17 }
 0x766   :  { %5294 = vmatmul.mubr.msk.f32.gmra.mrb[22].mxu1 %vm68_vm0, %v1822_v24 }
 0x767   :  { %5296 = vmatprep.mubr.msk.f32.mxu1 %vm68_vm0, %v1823_v25 }
 0x76a   :  { %5297 = vmatmul.mubr.msk.f32.gmra.mrb[24].mxu1 %vm68_vm0, %v1824_v1 }
 0x76b   :  { %5299 = vmatprep.mubr.msk.f32.mxu1 %vm68_vm0, %v1825_v26 }
 0x76e   :  { %5300 = vmatmul.mubr.msk.f32.gmra.mrb[26].mxu1 %vm68_vm0, %v1826_v27 }
 0x791   :  { %v1548_v28 = vpop.f32.mrb[12].mxu0 }
 0x792   :  { %v5266_v29 = vpop.f32.mrb[13].mxu0  ;;  %v1555_v30 = vsel %vm153_vm2, %v1548_v28, -inf }
 0x793   :  { %1556 = vmax.xlane.f32.xlu1 %v1555_v30 }
 0x797   :  { %1565 = vadd.xlane.f32.xlu1 %v1564_v31 }
 0x820   :  { %v1557_v32 = vpop.xlane.xlu1 %1556 }
 0x821   :  { %v1559_v33 = vsub.f32 %v1548_v28, %v1557_v32 }
 0x823   :  { %v1562_v34 = vmul.f32 1.442695, %v1559_v33 }
 0x824   :  { %v1566_v35 = vpop.xlane.xlu1 %1565 }
 0x825   :  { %5996 = vpow2.f32 %v1562_v34 }
 0x826   :  { %5998 = vrcp.f32 %v1566_v35 }
 0x82d   :  { %v1642_v36 = vpop.f32.mrb[18].mxu1 }
 0x82e   :  { %v5271_v38 = vpop.f32.mrb[19].mxu1 }
 0x82f   :  { %v5997_v39 = vpop.eup %5996 }
 0x830   :  { %v5999_v40 = vpop.eup %5998  ;;  %5275 = vmatmul.mubr.msk.f32.vlgmr.msra.gmra.mrb[14].mxu0 %vm153_vm2, %v5997_v39  ;;  %v1567_v41 = vsel %vm153_vm2, %v5997_v39, 0.0 }
 0x831   :  { %v1724_v42 = vmul.f32 %v5999_v40, %v1642_v36  ;;  %1568 = vadd.xlane.f32.xlu1 %v1567_v41 }
 0x833   :  { %5279 = vmatprep.mubr.msk.f32.mxu0 %vm153_vm2, %v1724_v42 }
 0x835   :  { %v5292_v44 = vpop.f32.mrb[20].mxu1 }
 0x836   :  { %v6493_v45 = vadd.f32 %v5292_v44, %v6489_v43  ;;  %v1921_v46 = vpop.f32.mrb[21].mxu1 }
 0x837   :  { %v6496_v47 = vadd.f32 %v1921_v46, %v6489_v43 }
 0x839   :  { %v5295_v48 = vpop.f32.mrb[22].mxu1  ;;  %v6500_v49 = vpack.i.bf16 %v6493_v45, %v6496_v47 }
 0x83a   :  { %v6503_v50 = vadd.f32 %v5295_v48, %v6489_v43  ;;  %v1931_v12 = vpop.f32.mrb[23].mxu1 }
 0x83b   :  { %v6506_v51 = vadd.f32 %v1931_v12, %v6489_v43  ;;  %5809 = vrot.lane.b32.xlu0 %v6500_v49, %s6210_s26 }
 0x83d   :  { %v5298_v52 = vpop.f32.mrb[24].mxu1  ;;  %v6512_v53 = vpack.i.bf16 %v6503_v50, %v6506_v51 }
 0x83e   :  { %v6515_v54 = vadd.f32 %v5298_v52, %v6489_v43  ;;  %v1941_v55 = vpop.f32.mrb[25].mxu1 }
 0x83f   :  { %v6518_v56 = vadd.f32 %v1941_v55, %v6489_v43  ;;  %5814 = vrot.lane.b32.xlu0 %v6512_v53, %s6210_s26 }
 0x841   :  { %v6524_v57 = vpack.i.bf16 %v6515_v54, %v6518_v56  ;;  %v5301_v58 = vpop.f32.mrb[26].mxu1  ;;  %5324 = vmatprep.mubr.msk.f32.mxu1 %vm153_vm2, %v6518_v56 }
 0x842   :  { %v6529_v59 = vadd.f32 %v5301_v58, %v6489_v43  ;;  %v1951_v16 = vpop.f32.mrb[27].mxu1  ;;  %1727 = vrot.lane.b32.xlu1 %v6291_v4, %s6217_s8 }
 0x843   :  { %5819 = vrot.lane.b32.xlu0 %v6524_v57, %s6210_s26  ;;  %v6536_v2 = vadd.f32 %v1951_v16, %v6489_v43 }
 0x845   :  { %v6540_v60 = vpack.i.bf16 %v6529_v59, %v6536_v2 }
 0x846   :  { %5834 = vrot.lane.b32.xlu1 %v6512_v53, %s6213_s28 }
 0x847   :  { %5824 = vrot.lane.b32.xlu0 %v6540_v60, %s6210_s26 }
 0x84a   :  { %5844 = vrot.lane.b32.xlu1 %v6500_v49, %s6211_s3 }
 0x84b   :  { %5829 = vrot.lane.b32.xlu0 %v6500_v49, %s6213_s28 }
 0x84e   :  { %5849 = vrot.lane.b32.xlu1 %v6540_v60, %s6213_s28 }
 0x84f   :  { %5839 = vrot.lane.b32.xlu0 %v6524_v57, %s6213_s28 }
 0x8ad   :  { %v5810_v4 = vpop.permute.xlu0 %5809 }
 0x8ae   :  { %v5812_v20 = vunpack.i.h.bf16 %v5810_v4  ;;  %v5811_v21 = vunpack.i.l.bf16 %v5810_v4 }
 0x8b0   :  { %v5598_v23 = vpack.c.bf16 %v5812_v20, %v5811_v21 }
 0x8b1   :  { %v5815_v61 = vpop.permute.xlu0 %5814 }
 0x8b2   :  { %v5817_v32 = vunpack.i.h.bf16 %v5815_v61  ;;  %v5816_v33 = vunpack.i.l.bf16 %v5815_v61 }
 0x8b4   :  { %v5604_v38 = vpack.c.bf16 %v5817_v32, %v5816_v33 }
 0x8b5   :  { %v5820_v62 = vpop.permute.xlu0 %5819 }
 0x8b6   :  { %v5822_v63 = vunpack.i.h.bf16 %v5820_v62  ;;  %v5821_v3 = vunpack.i.l.bf16 %v5820_v62 }
 0x8b8   :  { %v5610_v11 = vpack.c.bf16 %v5822_v63, %v5821_v3 }
 0x8b9   :  { %v5825_v14 = vpop.permute.xlu0 %5824 }
 0x8ba   :  { %5612 = vmatprep.subr.msk.bf16.mxu1 %vm6556_vm3, %v5610_v11  ;;  %v5827_v15 = vunpack.i.h.bf16 %v5825_v14  ;;  %v5826_v18 = vunpack.i.l.bf16 %v5825_v14 }
 0x8bb   :  { %5615 = vmatpush3.bf16.xpose.msk.msra.mxu1 %vm6556_vm3, %v5610_v11 }
 0x8bc   :  { %v5616_v19 = vpack.c.bf16 %v5827_v15, %v5826_v18 }
 0x8bd   :  { %v5830_v8 = vpop.permute.xlu0 %5829 }
 0x8be   :  { %v1569_v22 = vpop.xlane.xlu1 %1568  ;;  %5618 = vmatprep.subr.msk.bf16.mxu1 %vm6556_vm3, %v5616_v19  ;;  %v5832_v39 = vunpack.i.h.bf16 %v5830_v8  ;;  %v5831_v40 = vunpack.i.l.bf16 %v5830_v8 }
 0x8bf   :  { %6000 = vrcp.f32 %v1569_v22 }
 0x8c0   :  { %v5622_v41 = vpack.c.bf16 %v5832_v39, %v5831_v40 }
 0x8c1   :  { %v5840_v0 = vpop.permute.xlu0 %5839 }
 0x8c2   :  { %v1728_v17 = vpop.permute.xlu1 %1727  ;;  %v5842_v24 = vunpack.i.h.bf16 %v5840_v0  ;;  %v5841_v25 = vunpack.i.l.bf16 %v5840_v0 }
 0x8c3   :  { %5621 = vmatpush3.bf16.xpose.msk.msra.mxu1 %vm6556_vm3, %v5616_v19  ;;  %5277 = vmatprep.subr.mxu0 %v1728_v17 }
 0x8c4   :  { %5278 = vmatpush3.msra.mxu0 %v1728_v17  ;;  %v5630_v1 = vpack.c.bf16 %v5842_v24, %v5841_v25 }
 0x8c5   :  { %5600 = vmatprep.subr.msk.bf16.mxu0 %vm6556_vm3, %v5598_v23 }
 0x8c6   :  { %v5835_v26 = vpop.permute.xlu1 %5834  ;;  %5631 = vmatprep.subr.bf16.mxu1 %v5630_v1 }
 0x8c7   :  { %v5837_v42 = vunpack.i.h.bf16 %v5835_v26  ;;  %v5836_v44 = vunpack.i.l.bf16 %v5835_v26 }
 0x8c9   :  { %v6001_v34 = vpop.eup %6000  ;;  %v5626_v12 = vpack.c.bf16 %v5837_v42, %v5836_v44 }
 0x8ca   :  { %5325 = vmatmul.mubr.msk.f32.vlgmr.msra.gmra.mrb[28].mxu1 %vm153_vm2, %v6515_v54  ;;  %v5845_v27 = vpop.permute.xlu1 %5844 }
 0x8cb   :  { %5327 = vmatprep.mubr.msk.f32.mxu1 %vm153_vm2, %v6536_v2  ;;  %5633 = vmatpush3.bf16.msra.mxu1 %v5630_v1  ;;  %v5847_v46 = vunpack.i.h.bf16 %v5845_v27  ;;  %v5846_v48 = vunpack.i.l.bf16 %v5845_v27 }
 0x8cd   :  { %v6589_v52 = vpack.c.bf16 %v5847_v46, %v5846_v48 }
 0x8ce   :  { %5328 = vmatmul.mubr.msk.f32.gmra.mrb[30].mxu1 %vm153_vm2, %v6529_v59  ;;  %v5850_v28 = vpop.permute.xlu1 %5849 }
 0x8cf   :  { %v5852_v29 = vunpack.i.h.bf16 %v5850_v28  ;;  %v5851_v30 = vunpack.i.l.bf16 %v5850_v28 }
 0x8d1   :  { %v5634_v31 = vpack.c.bf16 %v5852_v29, %v5851_v30 }
 0x8d3   :  { %5635 = vmatprep.subr.bf16.mxu1 %v5634_v31 }
 0x8d4   :  { %5637 = vmatpush3.bf16.msra.mxu1 %v5634_v31 }
 0x903   :  { %v1718_v35 = vpop.f32.mrb[14].mxu0 }
 0x904   :  { %v1725_v36 = vmul.f32 %v6001_v34, %v1718_v35  ;;  %v5276_v37 = vpop.f32.mrb[15].mxu0 }
 0x906   :  { %5280 = vmatmul.mubr.msk.f32.vlgmr.msra.gmra.mrb[8].mxu0 %vm153_vm2, %v1725_v36 }
 0x907   :  { %5603 = vmatpush3.bf16.xpose.msk.msra.mxu0 %vm6556_vm3, %v5598_v23  ;;  %5310 = vmatprep.mubr.msk.f32.mxu0 %vm153_vm2, %v6496_v47 }
 0x908   :  { %5606 = vmatprep.subr.msk.bf16.mxu0 %vm6556_vm3, %v5604_v38 }
 0x90f   :  { %5609 = vmatpush3.bf16.xpose.msk.msra.mxu0 %vm6556_vm3, %v5604_v38 }
 0x910   :  { %5623 = vmatprep.subr.bf16.mxu0 %v5622_v41 }
 0x916   :  { %5311 = vmatmul.mubr.msk.f32.vlgmr.msra.gmra.mrb[16].mxu0 %vm153_vm2, %v6493_v45 }
 0x917   :  { %5313 = vmatprep.mubr.msk.f32.mxu0 %vm153_vm2, %v6506_v51  ;;  %5625 = vmatpush3.bf16.msra.mxu0 %v5622_v41 }
 0x918   :  { %5627 = vmatprep.subr.bf16.mxu0 %v5626_v12 }
 0x91a   :  { %5314 = vmatmul.mubr.msk.f32.gmra.mrb[18].mxu0 %vm153_vm2, %v6503_v50 }
 0x91b   :  { %5629 = vmatpush3.bf16.msra.mxu0 %v5626_v12 }
 0x91c   :  { %5640 = vmatprep.subr.msk.bf16.mxu0 %vm6556_vm3, %v6589_v52 }
 0x99d   :  { %v5326_v55 = vpop.f32.mrb[28].mxu1 }
 0x99e   :  { %v2167_v58 = vpop.f32.mrb[29].mxu1  ;;  %v2201_v16 = vsel %vm68_vm0, %v5326_v55, -inf }
 0x99f   :  { %2202 = vmax.xlane.f32.xlu1 %v2201_v16  ;;  %v2198_v4 = vsel %vm68_vm0, %v2167_v58, -inf }
 0x9a0   :  { %2199 = vmax.xlane.f32.xlu0 %v2198_v4 }
 0x9a1   :  { %v5329_v61 = vpop.f32.mrb[30].mxu1 }
 0x9a2   :  { %v2177_v62 = vpop.f32.mrb[31].mxu1  ;;  %v2207_v63 = vsel %vm68_vm0, %v5329_v61, -inf }
 0x9a3   :  { %v2204_v3 = vsel %vm68_vm0, %v2177_v62, -inf }
 0x9a4   :  { %2208 = vmax.xlane.f32.xlu0 %v2207_v63  ;;  %2205 = vmax.xlane.f32.xlu1 %v2204_v3 }
 0x9d9   :  { %v6600_v11 = vpop.f32.mrb[8].mxu0 }
 0x9da   :  { %v6602_v14 = vpop.f32.mrb[9].mxu0 }
 0x9e9   :  { %v5312_v15 = vpop.f32.mrb[16].mxu0 }
 0x9ea   :  { %v2054_v18 = vpop.f32.mrb[17].mxu0  ;;  %v2189_v19 = vsel %vm68_vm0, %v5312_v15, -inf }
 0x9eb   :  { %2190 = vmax.xlane.f32.xlu0 %v2189_v19  ;;  %v2186_v20 = vsel %vm68_vm0, %v2054_v18, -inf }
 0x9ec   :  { %2187 = vmax.xlane.f32.xlu1 %v2186_v20 }
 0x9ed   :  { %v6606_v21 = vpop.f32.mrb[18].mxu0 }
 0x9ee   :  { %v6608_v8 = vpop.f32.mrb[19].mxu0  ;;  %v2195_v23 = vsel %vm68_vm0, %v6606_v21, -inf }
 0x9ef   :  { %v2192_v22 = vsel %vm68_vm0, %v6608_v8, -inf }
 0x9fd   :  { %5859 = vrot.lane.b32.xlu1 %v6524_v57, %s6211_s3 }
 0xa01   :  { %5854 = vrot.lane.b32.xlu0 %v6512_v53, %s6211_s3 }
 0xa20   :  { %2193 = vmax.xlane.f32.xlu0 %v2192_v22 }
 0xa21   :  { %2196 = vmax.xlane.f32.xlu1 %v2195_v23 }
 0xa2c   :  { %v2203_v0 = vpop.xlane.xlu1 %2202 }
 0xa2d   :  { %v2215_v17 = vsub.f32 %v5326_v55, %v2203_v0  ;;  %v2200_v24 = vpop.xlane.xlu0 %2199 }
 0xa2e   :  { %v2214_v25 = vsub.f32 %v2167_v58, %v2200_v24 }
 0xa2f   :  { %v2228_v1 = vmul.f32 1.442695, %v2215_v17 }
 0xa30   :  { %v2226_v26 = vmul.f32 1.442695, %v2214_v25 }
 0xa31   :  { %v2209_v27 = vpop.xlane.xlu0 %2208  ;;  %v2206_v28 = vpop.xlane.xlu1 %2205 }
 0xa32   :  { %6002 = vpow2.f32 %v2226_v26  ;;  %v2217_v29 = vsub.f32 %v5329_v61, %v2209_v27  ;;  %v2216_v30 = vsub.f32 %v2177_v62, %v2206_v28  ;;  %2492 = vrot.lane.b32.xlu1 %v6496_v47, %s6212_s27 }
 0xa33   :  { %6004 = vpow2.f32 %v2228_v1 }
 0xa34   :  { %v2232_v31 = vmul.f32 1.442695, %v2217_v29  ;;  %v2230_v32 = vmul.f32 1.442695, %v2216_v30 }
 0xa36   :  { %6006 = vpow2.f32 %v2232_v31  ;;  %2496 = vrot.lane.b32.xlu1 %v6506_v51, %s6212_s27  ;;  %5864 = vrot.lane.b32.xlu0 %v6540_v60, %s6211_s3 }
 0xa37   :  { %6008 = vpow2.f32 %v2230_v32 }
 0xa3a   :  { %2609 = vrot.lane.b32.xlu1 %v6518_v56, %s6212_s27  ;;  %2494 = vrot.lane.b32.xlu0 %v6493_v45, %s6212_s27 }
 0xa3c   :  { %v6628_v33 = vpop.eup %6002 }
 0xa3d   :  { %v6630_v34 = vpop.eup %6004  ;;  %5352 = vmatprep.mubr.msk.f32.mxu1 %vm68_vm0, %v6628_v33 }
 0xa3e   :  { %5353 = vmatmul.mubr.msk.f32.vlgmr.msra.gmra.mrb[32].mxu1 %vm68_vm0, %v6630_v34  ;;  %2613 = vrot.lane.b32.xlu1 %v6536_v2, %s6212_s27 }
 0xa3f   :  { %2498 = vrot.lane.b32.xlu0 %v6503_v50, %s6212_s27 }
 0xa40   :  { %v6640_v35 = vpop.eup %6006 }
 0xa41   :  { %v6642_v36 = vpop.eup %6008 }
 0xa42   :  { %5355 = vmatprep.mubr.msk.f32.mxu1 %vm68_vm0, %v6642_v36  ;;  %5874 = vrot.lane.b32.xlu1 %v6512_v53, %s6214_s29 }
 0xa43   :  { %5356 = vmatmul.mubr.msk.f32.gmra.mrb[34].mxu1 %vm68_vm0, %v6640_v35  ;;  %2611 = vrot.lane.b32.xlu0 %v6515_v54, %s6212_s27 }
 0xa47   :  { %2615 = vrot.lane.b32.xlu0 %v6529_v59, %s6212_s27 }
 0xa4b   :  { %5869 = vrot.lane.b32.xlu0 %v6500_v49, %s6214_s29 }
 0xa78   :  { %v2191_v37 = vpop.xlane.xlu0 %2190 }
 0xa79   :  { %v2211_v38 = vsub.f32 %v5312_v15, %v2191_v37  ;;  %v2188_v39 = vpop.xlane.xlu1 %2187 }
 0xa7a   :  { %v2210_v40 = vsub.f32 %v2054_v18, %v2188_v39 }
 0xa7b   :  { %v2220_v41 = vmul.f32 1.442695, %v2211_v38 }
 0xa7c   :  { %v2218_v42 = vmul.f32 1.442695, %v2210_v40  ;;  %v5855_v55 = vpop.permute.xlu0 %5854 }
 0xa7d   :  { %v5860_v44 = vpop.permute.xlu1 %5859  ;;  %v5857_v58 = vunpack.i.h.bf16 %v5855_v55  ;;  %v5856_v16 = vunpack.i.l.bf16 %v5855_v55 }
 0xa7e   :  { %6010 = vpow2.f32 %v2218_v42  ;;  %v5862_v46 = vunpack.i.h.bf16 %v5860_v44  ;;  %v5861_v48 = vunpack.i.l.bf16 %v5860_v44 }
 0xa7f   :  { %6012 = vpow2.f32 %v2220_v41  ;;  %v5644_v62 = vpack.c.bf16 %v5857_v58, %v5856_v16 }
 0xa80   :  { %v5650_v12 = vpack.c.bf16 %v5862_v46, %v5861_v48 }
 0xa82   :  { %5652 = vmatprep.subr.msk.bf16.mxu1 %vm6556_vm3, %v5650_v12 }
 0xa83   :  { %5655 = vmatpush3.bf16.xpose.msk.msra.mxu1 %vm6556_vm3, %v5650_v12 }
 0xa88   :  { %v6660_v4 = vpop.eup %6010 }
 0xa89   :  { %v6662_v61 = vpop.eup %6012  ;;  %5338 = vmatprep.mubr.msk.f32.mxu0 %vm68_vm0, %v6660_v4 }
 0xa8a   :  { %5339 = vmatmul.mubr.msk.f32.vlgmr.msra.gmra.mrb[20].mxu0 %vm68_vm0, %v6662_v61 }
 0xa8b   :  { %5643 = vmatpush3.bf16.xpose.msk.msra.mxu0 %vm6556_vm3, %v6589_v52 }
 0xa8c   :  { %5646 = vmatprep.subr.msk.bf16.mxu0 %vm6556_vm3, %v5644_v62 }
 0xa93   :  { %5649 = vmatpush3.bf16.xpose.msk.msra.mxu0 %vm6556_vm3, %v5644_v62 }
 0xaad   :  { %v2194_v63 = vpop.xlane.xlu0 %2193 }
 0xaae   :  { %v2212_v3 = vsub.f32 %v6608_v8, %v2194_v63  ;;  %v2197_v15 = vpop.xlane.xlu1 %2196 }
 0xaaf   :  { %v2213_v18 = vsub.f32 %v6606_v21, %v2197_v15 }
 0xab0   :  { %v2222_v19 = vmul.f32 1.442695, %v2212_v3 }
 0xab1   :  { %v2224_v20 = vmul.f32 1.442695, %v2213_v18  ;;  %v5865_v22 = vpop.permute.xlu0 %5864 }
 0xab2   :  { %6014 = vpow2.f32 %v2222_v19  ;;  %v5867_v23 = vunpack.i.h.bf16 %v5865_v22  ;;  %v5866_v0 = vunpack.i.l.bf16 %v5865_v22  ;;  %v2493_v17 = vpop.permute.xlu1 %2492 }
 0xab3   :  { %6016 = vpow2.f32 %v2224_v20 }
 0xab4   :  { %v5656_v52 = vpack.c.bf16 %v5867_v23, %v5866_v0 }
 0xab5   :  { %v2495_v24 = vpop.permute.xlu0 %2494 }
 0xab6   :  { %v2497_v25 = vpop.permute.xlu1 %2496  ;;  %5658 = vmatprep.subr.msk.bf16.mxu1 %vm6556_vm3, %v5656_v52 }
 0xab7   :  { %5661 = vmatpush3.bf16.xpose.msk.msra.mxu1 %vm6556_vm3, %v5656_v52 }
 0xab9   :  { %v2499_v8 = vpop.permute.xlu0 %2498 }
 0xaba   :  { %v2610_v1 = vpop.permute.xlu1 %2609 }
 0xabb   :  { %5380 = vmatprep.mubr.msk.f32.mxu1 %vm153_vm2, %v2610_v1 }
 0xabc   :  { %v6682_v21 = vpop.eup %6014 }
 0xabd   :  { %v6684_v26 = vpop.eup %6016  ;;  %5341 = vmatprep.mubr.msk.f32.mxu0 %vm68_vm0, %v6682_v21  ;;  %v2612_v27 = vpop.permute.xlu0 %2611 }
 0xabe   :  { %v2614_v28 = vpop.permute.xlu1 %2613  ;;  %5342 = vmatmul.mubr.msk.f32.gmra.mrb[22].mxu0 %vm68_vm0, %v6684_v26  ;;  %5381 = vmatmul.mubr.msk.f32.vlgmr.msra.gmra.mrb[36].mxu1 %vm153_vm2, %v2612_v27 }
 0xabf   :  { %5366 = vmatprep.mubr.msk.f32.mxu0 %vm153_vm2, %v2493_v17  ;;  %5383 = vmatprep.mubr.msk.f32.mxu1 %vm153_vm2, %v2614_v28 }
 0xac1   :  { %v2616_v29 = vpop.permute.xlu0 %2615 }
 0xac2   :  { %5367 = vmatmul.mubr.msk.f32.vlgmr.msra.gmra.mrb[24].mxu0 %vm153_vm2, %v2495_v24  ;;  %5384 = vmatmul.mubr.msk.f32.gmra.mrb[38].mxu1 %vm153_vm2, %v2616_v29  ;;  %v5875_v30 = vpop.permute.xlu1 %5874 }
 0xac3   :  { %5369 = vmatprep.mubr.msk.f32.mxu0 %vm153_vm2, %v2497_v25  ;;  %v5877_v32 = vunpack.i.h.bf16 %v5875_v30  ;;  %v5876_v37 = vunpack.i.l.bf16 %v5875_v30 }
 0xac5   :  { %v5870_v31 = vpop.permute.xlu0 %5869  ;;  %v5666_v41 = vpack.c.bf16 %v5877_v32, %v5876_v37 }
 0xac6   :  { %v5872_v38 = vunpack.i.h.bf16 %v5870_v31  ;;  %v5871_v39 = vunpack.i.l.bf16 %v5870_v31  ;;  %5370 = vmatmul.mubr.msk.f32.gmra.mrb[26].mxu0 %vm153_vm2, %v2499_v8 }
 0xac8   :  { %v5662_v40 = vpack.c.bf16 %v5872_v38, %v5871_v39 }
 0xaca   :  { %5663 = vmatprep.subr.bf16.mxu0 %v5662_v40 }
 0xacb   :  { %5665 = vmatpush3.bf16.msra.mxu0 %v5662_v40 }
 0xacc   :  { %5667 = vmatprep.subr.bf16.mxu0 %v5666_v41 }
 0xacf   :  { %5669 = vmatpush3.bf16.msra.mxu0 %v5666_v41 }
 0xb11   :  { %v6697_v42 = vpop.f32.mrb[32].mxu1 }
 0xb12   :  { %v6699_v44 = vpop.f32.mrb[33].mxu1 }
 0xb16   :  { %v6701_v46 = vpop.f32.mrb[34].mxu1 }
 0xb17   :  { %v6703_v48 = vpop.f32.mrb[35].mxu1 }
 0xb5d   :  { %v6705_v12 = vpop.f32.mrb[20].mxu0 }
 0xb5e   :  { %v6707_v55 = vpop.f32.mrb[21].mxu0 }
 0xb91   :  { %v6709_v58 = vpop.f32.mrb[22].mxu0  ;;  %v5382_v16 = vpop.f32.mrb[36].mxu1 }
 0xb92   :  { %v6711_v62 = vpop.f32.mrb[23].mxu0  ;;  %v2707_v63 = vpop.f32.mrb[37].mxu1  ;;  %v2741_v3 = vsel %vm68_vm0, %v5382_v16, -inf }
 0xb93   :  { %2742 = vmax.xlane.f32.xlu1 %v2741_v3  ;;  %v2738_v15 = vsel %vm68_vm0, %v2707_v63, -inf }
 0xb94   :  { %2739 = vmax.xlane.f32.xlu0 %v2738_v15 }
 0xb95   :  { %v5368_v18 = vpop.f32.mrb[24].mxu0  ;;  %v5385_v19 = vpop.f32.mrb[38].mxu1 }
 0xb96   :  { %v2590_v20 = vpop.f32.mrb[25].mxu0  ;;  %v2717_v22 = vpop.f32.mrb[39].mxu1  ;;  %v2747_v23 = vsel %vm68_vm0, %v5385_v19, -inf  ;;  %v2729_v25 = vsel %vm68_vm0, %v5368_v18, -inf }
 0xb97   :  { %2748 = vmax.xlane.f32.xlu1 %v2747_v23  ;;  %v2744_v0 = vsel %vm68_vm0, %v2717_v22, -inf  ;;  %v2726_v24 = vsel %vm68_vm0, %v2590_v20, -inf }
 0xb98   :  { %2745 = vmax.xlane.f32.xlu0 %v2744_v0 }
 0xb99   :  { %v5371_v17 = vpop.f32.mrb[26].mxu0 }
 0xb9a   :  { %v2600_v52 = vpop.f32.mrb[27].mxu0  ;;  %v2735_v8 = vsel %vm68_vm0, %v5371_v17, -inf }
 0xb9b   :  { %2727 = vmax.xlane.f32.xlu1 %v2726_v24  ;;  %v2732_v1 = vsel %vm68_vm0, %v2600_v52, -inf }
 0xb9c   :  { %2730 = vmax.xlane.f32.xlu0 %v2729_v25 }
 0xb9f   :  { %2736 = vmax.xlane.f32.xlu1 %v2735_v8 }
 0xba0   :  { %2733 = vmax.xlane.f32.xlu0 %v2732_v1 }
 0xbb0   :  { %5879 = vrot.lane.b32.xlu1 %v6524_v57, %s6214_s29 }
 0xbb6   :  { %5884 = vrot.lane.b32.xlu0 %v6540_v60, %s6214_s29 }
 0xc20   :  { %v2743_v27 = vpop.xlane.xlu1 %2742 }
 0xc21   :  { %v2755_v28 = vsub.f32 %v5382_v16, %v2743_v27  ;;  %v2740_v29 = vpop.xlane.xlu0 %2739 }
 0xc22   :  { %v2754_v30 = vsub.f32 %v2707_v63, %v2740_v29 }
 0xc23   :  { %v2768_v31 = vmul.f32 1.442695, %v2755_v28 }
 0xc24   :  { %v2766_v32 = vmul.f32 1.442695, %v2754_v30  ;;  %v2749_v37 = vpop.xlane.xlu1 %2748 }
 0xc25   :  { %6018 = vpow2.f32 %v2768_v31  ;;  %v2757_v38 = vsub.f32 %v5385_v19, %v2749_v37  ;;  %v2746_v39 = vpop.xlane.xlu0 %2745 }
 0xc26   :  { %6020 = vpow2.f32 %v2766_v32  ;;  %v2756_v40 = vsub.f32 %v2717_v22, %v2746_v39 }
 0xc27   :  { %v2772_v41 = vmul.f32 1.442695, %v2757_v38 }
 0xc28   :  { %v2770_v3 = vmul.f32 1.442695, %v2756_v40  ;;  %v2728_v15 = vpop.xlane.xlu1 %2727 }
 0xc29   :  { %6022 = vpow2.f32 %v2772_v41  ;;  %v2750_v23 = vsub.f32 %v2590_v20, %v2728_v15  ;;  %v2731_v0 = vpop.xlane.xlu0 %2730 }
 0xc2a   :  { %6024 = vpow2.f32 %v2770_v3  ;;  %v2751_v24 = vsub.f32 %v5368_v18, %v2731_v0 }
 0xc2b   :  { %v2758_v25 = vmul.f32 1.442695, %v2750_v23 }
 0xc2c   :  { %v2760_v16 = vmul.f32 1.442695, %v2751_v24  ;;  %v2737_v8 = vpop.xlane.xlu1 %2736 }
 0xc2d   :  { %6026 = vpow2.f32 %v2758_v25  ;;  %v2753_v63 = vsub.f32 %v5371_v17, %v2737_v8  ;;  %v2734_v1 = vpop.xlane.xlu0 %2733 }
 0xc2e   :  { %6028 = vpow2.f32 %v2760_v16  ;;  %v2752_v27 = vsub.f32 %v2600_v52, %v2734_v1 }
 0xc2f   :  { %v6019_v19 = vpop.eup %6018  ;;  %v2764_v28 = vmul.f32 1.442695, %v2753_v63 }
 0xc30   :  { %v6021_v29 = vpop.eup %6020  ;;  %v2762_v22 = vmul.f32 1.442695, %v2752_v27  ;;  %v5880_v30 = vpop.permute.xlu1 %5879  ;;  %v2789_v31 = vsel %vm68_vm0, %v6019_v19, 0.0  ;;  %v2237_v27 = vsel %vm68_vm0, %v6662_v61, 0.0  ;;  %v2249_v61 = vsel %vm68_vm0, %v6630_v34, 0.0 }
 0xc31   :  { %6030 = vpow2.f32 %v2764_v28  ;;  %v5882_v20 = vunpack.i.h.bf16 %v5880_v30  ;;  %v5881_v32 = vunpack.i.l.bf16 %v5880_v30  ;;  %5408 = vmatprep.mubr.msk.f32.mxu1 %vm68_vm0, %v6021_v29  ;;  %2790 = vadd.xlane.f32.xlu1 %v2789_v31  ;;  %v5885_v18 = vpop.permute.xlu0 %5884  ;;  %v2786_v37 = vsel %vm68_vm0, %v6021_v29, 0.0 }
 0xc32   :  { %6032 = vpow2.f32 %v2762_v22  ;;  %v5887_v17 = vunpack.i.h.bf16 %v5885_v18  ;;  %v5886_v38 = vunpack.i.l.bf16 %v5885_v18  ;;  %2787 = vadd.xlane.f32.xlu0 %v2786_v37  ;;  %v2246_v28 = vsel %vm68_vm0, %v6628_v33, 0.0 }
 0xc33   :  { %v6023_v52 = vpop.eup %6022  ;;  %v5670_v39 = vpack.c.bf16 %v5882_v20, %v5881_v32  ;;  %v2243_v29 = vsel %vm68_vm0, %v6684_v26, 0.0 }
 0xc34   :  { %v6025_v40 = vpop.eup %6024  ;;  %v5674_v41 = vpack.c.bf16 %v5887_v17, %v5886_v38  ;;  %v2795_v3 = vsel %vm68_vm0, %v6023_v52, 0.0 }
 0xc35   :  { %2796 = vadd.xlane.f32.xlu1 %v2795_v3  ;;  %5671 = vmatprep.subr.bf16.mxu1 %v5670_v39  ;;  %v2792_v15 = vsel %vm68_vm0, %v6025_v40, 0.0 }
 0xc36   :  { %5673 = vmatpush3.bf16.msra.mxu1 %v5670_v39  ;;  %2793 = vadd.xlane.f32.xlu0 %v2792_v15 }
 0xc37   :  { %v6027_v23 = vpop.eup %6026  ;;  %5675 = vmatprep.subr.bf16.mxu1 %v5674_v41 }
 0xc38   :  { %v6029_v0 = vpop.eup %6028  ;;  %5394 = vmatprep.mubr.msk.f32.mxu0 %vm68_vm0, %v6027_v23  ;;  %v2774_v24 = vsel %vm68_vm0, %v6027_v23, 0.0 }
 0xc39   :  { %2775 = vadd.xlane.f32.xlu1 %v2774_v24  ;;  %5395 = vmatmul.mubr.msk.f32.vlgmr.msra.gmra.mrb[28].mxu0 %vm68_vm0, %v6029_v0  ;;  %v2777_v25 = vsel %vm68_vm0, %v6029_v0, 0.0 }
 0xc3a   :  { %2778 = vadd.xlane.f32.xlu0 %v2777_v25  ;;  %5677 = vmatpush3.bf16.msra.mxu1 %v5674_v41 }
 0xc3b   :  { %v6031_v16 = vpop.eup %6030 }
 0xc3c   :  { %v6033_v8 = vpop.eup %6032  ;;  %v2783_v63 = vsel %vm68_vm0, %v6031_v16, 0.0 }
 0xc3d   :  { %2784 = vadd.xlane.f32.xlu1 %v2783_v63  ;;  %5397 = vmatprep.mubr.msk.f32.mxu0 %vm68_vm0, %v6033_v8  ;;  %v2780_v1 = vsel %vm68_vm0, %v6033_v8, 0.0 }
 0xc3e   :  { %5409 = vmatmul.mubr.msk.f32.vlgmr.msra.gmra.mrb[40].mxu1 %vm68_vm0, %v6019_v19  ;;  %5398 = vmatmul.mubr.msk.f32.gmra.mrb[30].mxu0 %vm68_vm0, %v6031_v16  ;;  %v2240_v19 = vsel %vm68_vm0, %v6682_v21, 0.0  ;;  %v2255_v21 = vsel %vm68_vm0, %v6640_v35, 0.0 }
 0xc3f   :  { %2781 = vadd.xlane.f32.xlu0 %v2780_v1  ;;  %5411 = vmatprep.mubr.msk.f32.mxu1 %vm68_vm0, %v6025_v40 }
 0xc42   :  { %5412 = vmatmul.mubr.msk.f32.gmra.mrb[42].mxu1 %vm68_vm0, %v6023_v52 }
 0xc4e   :  { %5889 = vrot.lane.b32.xlu1 %v6500_v49, %s6215_s30 }
 0xc52   :  { %5894 = vrot.lane.b32.xlu1 %v6512_v53, %s6215_s30 }
 0xc55   :  { %3033 = vrot.lane.b32.xlu0 %v6468_v7, %s6217_s8  ;;  %v2234_v7 = vsel %vm68_vm0, %v6660_v4, 0.0  ;;  %v2252_v4 = vsel %vm68_vm0, %v6642_v36, 0.0 }
 0xc56   :  { %3298 = vrot.lane.b32.xlu1 %v6496_v47, %s6216_s7 }
 0xc59   :  { %5899 = vrot.lane.b32.xlu0 %v6524_v57, %s6215_s30 }
 0xc5a   :  { %5904 = vrot.lane.b32.xlu1 %v6540_v60, %s6215_s30 }
 0xc5d   :  { %3300 = vrot.lane.b32.xlu0 %v6493_v45, %s6216_s7 }
 0xc5e   :  { %3304 = vrot.lane.b32.xlu1 %v6503_v50, %s6216_s7 }
 0xc61   :  { %3302 = vrot.lane.b32.xlu0 %v6506_v51, %s6216_s7 }
 0xc62   :  { %3417 = vrot.lane.b32.xlu1 %v6515_v54, %s6216_s7 }
 0xc65   :  { %3415 = vrot.lane.b32.xlu0 %v6518_v56, %s6216_s7 }
 0xc66   :  { %3421 = vrot.lane.b32.xlu1 %v6529_v59, %s6216_s7 }
 0xc69   :  { %3419 = vrot.lane.b32.xlu0 %v6536_v2, %s6216_s7 }
 0xc88   :  { %2235 = vadd.xlane.f32.xlu0 %v2234_v7 }
 0xc8a   :  { %2238 = vadd.xlane.f32.xlu1 %v2237_v27 }
 0xc8c   :  { %2241 = vadd.xlane.f32.xlu0 %v2240_v19 }
 0xc8e   :  { %2247 = vadd.xlane.f32.xlu1 %v2246_v28 }
 0xc90   :  { %2244 = vadd.xlane.f32.xlu0 %v2243_v29 }
 0xc92   :  { %2253 = vadd.xlane.f32.xlu1 %v2252_v4 }
 0xc94   :  { %2250 = vadd.xlane.f32.xlu0 %v2249_v61 }
 0xc98   :  { %2256 = vadd.xlane.f32.xlu0 %v2255_v21 }
 0xca3   :  { %3166 = vrot.lane.b32.xlu1 %v6466_v6, %s6217_s8 }
 0xcbe   :  { %v2791_v33 = vpop.xlane.xlu1 %2790 }
 0xcbf   :  { %v2788_v22 = vpop.xlane.xlu0 %2787 }
 0xcc2   :  { %v2797_v30 = vpop.xlane.xlu1 %2796 }
 0xcc3   :  { %v2794_v26 = vpop.xlane.xlu0 %2793 }
 0xcc6   :  { %v2776_v31 = vpop.xlane.xlu1 %2775 }
 0xcc7   :  { %v2779_v20 = vpop.xlane.xlu0 %2778  ;;  %6034 = vrcp.f32 %v2776_v31 }
 0xcc8   :  { %6036 = vrcp.f32 %v2779_v20 }
 0xcc9   :  { %6038 = vrcp.f32 %v2791_v33 }
 0xcca   :  { %v2785_v32 = vpop.xlane.xlu1 %2784  ;;  %6040 = vrcp.f32 %v2788_v22 }
 0xccc   :  { %v2782_v36 = vpop.xlane.xlu0 %2781 }
 0xccd   :  { %6042 = vrcp.f32 %v2782_v36 }
 0xcce   :  { %v5890_v18 = vpop.permute.xlu1 %5889  ;;  %6044 = vrcp.f32 %v2785_v32 }
 0xccf   :  { %v5892_v37 = vunpack.i.h.bf16 %v5890_v18  ;;  %v5891_v17 = vunpack.i.l.bf16 %v5890_v18  ;;  %6046 = vrcp.f32 %v2797_v30 }
 0xcd0   :  { %v3034_v34 = vpop.permute.xlu0 %3033  ;;  %6048 = vrcp.f32 %v2794_v26 }
 0xcd1   :  { %v5678_v38 = vpack.c.bf16 %v5892_v37, %v5891_v17  ;;  %5414 = vmatprep.subr.mxu1 %v3034_v34  ;;  %v6035_v0 = vpop.eup %6034 }
 0xcd2   :  { %5415 = vmatpush3.msra.mxu1 %v3034_v34  ;;  %v5895_v35 = vpop.permute.xlu1 %5894  ;;  %v6037_v63 = vpop.eup %6036 }
 0xcd3   :  { %5680 = vmatprep.subr.msk.bf16.mxu1 %vm6556_vm3, %v5678_v38  ;;  %v5897_v24 = vunpack.i.h.bf16 %v5895_v35  ;;  %v5896_v25 = vunpack.i.l.bf16 %v5895_v35  ;;  %v6039_v27 = vpop.eup %6038 }
 0xcd4   :  { %v5900_v6 = vpop.permute.xlu0 %5899  ;;  %v6041_v28 = vpop.eup %6040 }
 0xcd5   :  { %v5684_v29 = vpack.c.bf16 %v5897_v24, %v5896_v25  ;;  %v5902_v37 = vunpack.i.h.bf16 %v5900_v6  ;;  %v5901_v17 = vunpack.i.l.bf16 %v5900_v6 }
 0xcd6   :  { %v6787_v52 = vpop.permute.xlu1 %3298 }
 0xcd7   :  { %v6043_v21 = vpop.eup %6042 }
 0xcd8   :  { %v6789_v39 = vpop.permute.xlu0 %3300  ;;  %v6045_v26 = vpop.eup %6044 }
 0xcd9   :  { %v6047_v18 = vpop.eup %6046 }
 0xcda   :  { %v6791_v40 = vpop.permute.xlu1 %5904 }
 0xcdc   :  { %v6793_v41 = vpop.permute.xlu0 %3302 }
 0xcde   :  { %v6795_v3 = vpop.permute.xlu1 %3304 }
 0xce0   :  { %v6797_v15 = vpop.permute.xlu0 %3415 }
 0xce2   :  { %v6799_v16 = vpop.permute.xlu1 %3417 }
 0xce4   :  { %v6801_v19 = vpop.permute.xlu0 %3419 }
 0xce6   :  { %v6807_v31 = vpop.permute.xlu1 %3421 }
 0xd0c   :  { %v5396_v23 = vpop.f32.mrb[28].mxu0 }
 0xd0d   :  { %v2888_v8 = vpop.f32.mrb[29].mxu0  ;;  %v3025_v7 = vmul.f32 %v6037_v63, %v5396_v23  ;;  %v6049_v23 = vpop.eup %6048 }
 0xd0e   :  { %v3024_v1 = vmul.f32 %v6035_v0, %v2888_v8  ;;  %v5690_v8 = vpack.c.bf16 %v5902_v37, %v5901_v17 }
 0xd10   :  { %5416 = vmatprep.mubr.msk.f32.mxu1 %vm153_vm2, %v3024_v1 }
 0xd11   :  { %v5410_v4 = vpop.f32.mrb[40].mxu1  ;;  %v5399_v61 = vpop.f32.mrb[30].mxu0  ;;  %5417 = vmatmul.mubr.msk.f32.vlgmr.msra.gmra.mrb[44].mxu1 %vm153_vm2, %v3025_v7  ;;  %v5907_v7 = vunpack.i.h.bf16 %v6791_v40 }
 0xd12   :  { %v3029_v33 = vmul.f32 %v6039_v27, %v5410_v4  ;;  %v2997_v22 = vpop.f32.mrb[41].mxu1  ;;  %5683 = vmatpush3.bf16.xpose.msk.msra.mxu1 %vm6556_vm3, %v5678_v38  ;;  %v2898_v30 = vpop.f32.mrb[31].mxu0  ;;  %v3027_v36 = vmul.f32 %v6045_v26, %v5399_v61  ;;  %v5906_v27 = vunpack.i.l.bf16 %v6791_v40 }
 0xd13   :  { %v3028_v20 = vmul.f32 %v6041_v28, %v2997_v22  ;;  %v3026_v32 = vmul.f32 %v6043_v21, %v2898_v30  ;;  %5686 = vmatprep.subr.msk.bf16.mxu1 %vm6556_vm3, %v5684_v29 }
 0xd15   :  { %v2236_v34 = vpop.xlane.xlu0 %2235  ;;  %v5413_v35 = vpop.f32.mrb[42].mxu1  ;;  %5419 = vmatprep.mubr.msk.f32.mxu1 %vm153_vm2, %v3026_v32 }
 0xd16   :  { %6050 = vrcp.f32 %v2236_v34  ;;  %v3031_v38 = vmul.f32 %v6047_v18, %v5413_v35  ;;  %v3007_v0 = vpop.f32.mrb[43].mxu1  ;;  %5420 = vmatmul.mubr.msk.f32.gmra.mrb[46].mxu1 %vm153_vm2, %v3027_v36 }
 0xd17   :  { %v3030_v24 = vmul.f32 %v6049_v23, %v3007_v0  ;;  %v2239_v25 = vpop.xlane.xlu1 %2238  ;;  %5422 = vmatprep.mubr.msk.f32.mxu1 %vm153_vm2, %v3028_v20 }
 0xd18   :  { %6052 = vrcp.f32 %v2239_v25 }
 0xd19   :  { %v2242_v63 = vpop.xlane.xlu0 %2241 }
 0xd1a   :  { %6054 = vrcp.f32 %v2242_v63  ;;  %5689 = vmatpush3.bf16.xpose.msk.msra.mxu1 %vm6556_vm3, %v5684_v29 }
 0xd1b   :  { %5423 = vmatmul.mubr.msk.f32.gmra.mrb[48].mxu1 %vm153_vm2, %v3029_v33  ;;  %5692 = vmatprep.subr.msk.bf16.mxu1 %vm6556_vm3, %v5690_v8  ;;  %v2248_v6 = vpop.xlane.xlu1 %2247  ;;  %v5696_v33 = vpack.c.bf16 %v5907_v7, %v5906_v27 }
 0xd1c   :  { %5425 = vmatprep.mubr.msk.f32.mxu1 %vm153_vm2, %v3030_v24  ;;  %6056 = vrcp.f32 %v2248_v6 }
 0xd1d   :  { %v2245_v1 = vpop.xlane.xlu0 %2244 }
 0xd1e   :  { %6058 = vrcp.f32 %v2245_v1 }
 0xd1f   :  { %5426 = vmatmul.mubr.msk.f32.gmra.mrb[50].mxu1 %vm153_vm2, %v3031_v38  ;;  %v2254_v28 = vpop.xlane.xlu1 %2253 }
 0xd20   :  { %v6051_v4 = vpop.eup %6050  ;;  %5450 = vmatprep.mubr.msk.f32.mxu1 %vm153_vm2, %v6787_v52  ;;  %6060 = vrcp.f32 %v2254_v28  ;;  %v6130_v28 = vld [vmem:[#allocation6 + $0x30] sm:$0xff] }
 0xd21   :  { %v2251_v29 = vpop.xlane.xlu0 %2250  ;;  %v2484_v61 = vmul.f32 %v6051_v4, %v6707_v55 }
 0xd22   :  { %v6053_v21 = vpop.eup %6052  ;;  %6062 = vrcp.f32 %v2251_v29 }
 0xd23   :  { %v2485_v22 = vmul.f32 %v6053_v21, %v6705_v12  ;;  %5430 = vmatprep.mubr.msk.f32.mxu0 %vm153_vm2, %v2484_v61  ;;  %5451 = vmatmul.mubr.msk.f32.vlgmr.msra.gmra.mrb[52].mxu1 %vm153_vm2, %v6789_v39  ;;  %v3167_v40 = vpop.permute.xlu1 %3166 }
 0xd24   :  { %v6055_v30 = vpop.eup %6054  ;;  %5695 = vmatpush3.bf16.xpose.msk.msra.mxu1 %vm6556_vm3, %v5690_v8  ;;  %5453 = vmatprep.mubr.msk.f32.mxu1 %vm153_vm2, %v6793_v41 }
 0xd25   :  { %5698 = vmatprep.subr.msk.bf16.mxu1 %vm6556_vm3, %v5696_v33  ;;  %5428 = vmatprep.subr.mxu0 %v3167_v40  ;;  %v2257_v55 = vpop.xlane.xlu0 %2256  ;;  %v2486_v12 = vmul.f32 %v6055_v30, %v6711_v62 }
 0xd26   :  { %6064 = vrcp.f32 %v2257_v55  ;;  %5429 = vmatpush3.msra.mxu0 %v3167_v40  ;;  %v6057_v52 = vpop.eup %6056 }
 0xd27   :  { %5431 = vmatmul.mubr.msk.f32.vlgmr.msra.gmra.mrb[32].mxu0 %vm153_vm2, %v2485_v22  ;;  %5454 = vmatmul.mubr.msk.f32.gmra.mrb[54].mxu1 %vm153_vm2, %v6795_v3  ;;  %v2488_v26 = vmul.f32 %v6057_v52, %v6699_v44 }
 0xd28   :  { %v6059_v39 = vpop.eup %6058  ;;  %5433 = vmatprep.mubr.msk.f32.mxu0 %vm153_vm2, %v2486_v12  ;;  %5464 = vmatprep.mubr.msk.f32.mxu1 %vm153_vm2, %v6797_v15 }
 0xd29   :  { %v2487_v41 = vmul.f32 %v6059_v39, %v6709_v58 }
 0xd2a   :  { %v6061_v20 = vpop.eup %6060 }
 0xd2b   :  { %5434 = vmatmul.mubr.msk.f32.gmra.mrb[34].mxu0 %vm153_vm2, %v2487_v41  ;;  %v2490_v32 = vmul.f32 %v6061_v20, %v6703_v48 }
 0xd2c   :  { %v6063_v62 = vpop.eup %6062  ;;  %5701 = vmatpush3.bf16.xpose.msk.msra.mxu1 %vm6556_vm3, %v5696_v33  ;;  %5436 = vmatprep.mubr.msk.f32.mxu0 %vm153_vm2, %v2488_v26 }
 0xd2d   :  { %v2489_v3 = vmul.f32 %v6063_v62, %v6697_v42 }
 0xd2f   :  { %5437 = vmatmul.mubr.msk.f32.gmra.mrb[36].mxu0 %vm153_vm2, %v2489_v3 }
 0xd30   :  { %v6065_v15 = vpop.eup %6064  ;;  %5439 = vmatprep.mubr.msk.f32.mxu0 %vm153_vm2, %v2490_v32 }
 0xd31   :  { %v2491_v44 = vmul.f32 %v6065_v15, %v6701_v46 }
 0xd33   :  { %5465 = vmatmul.mubr.msk.f32.vlgmr.msra.gmra.mrb[56].mxu1 %vm153_vm2, %v6799_v16  ;;  %5440 = vmatmul.mubr.msk.f32.gmra.mrb[38].mxu0 %vm153_vm2, %v2491_v44 }
 0xd34   :  { %5467 = vmatprep.mubr.msk.f32.mxu1 %vm153_vm2, %v6801_v19 }
 0xd37   :  { %5468 = vmatmul.mubr.msk.f32.gmra.mrb[58].mxu1 %vm153_vm2, %v6807_v31 }
 0xde4   :  { %v6861_v42 = vpop.f32.mrb[44].mxu1 }
 0xde5   :  { %v6863_v48 = vpop.f32.mrb[45].mxu1 }
 0xde9   :  { %v6865_v58 = vpop.f32.mrb[46].mxu1 }
 0xdea   :  { %v6867_v36 = vpop.f32.mrb[47].mxu1 }
 0xdee   :  { %v6869_v46 = vpop.f32.mrb[48].mxu1 }
 0xdef   :  { %v6871_v18 = vpop.f32.mrb[49].mxu1 }
 0xdf2   :  { %v6873_v16 = vpop.f32.mrb[50].mxu1 }
 0xdf3   :  { %v6875_v37 = vpop.f32.mrb[51].mxu1 }
 0xdf6   :  { %v5452_v19 = vpop.f32.mrb[52].mxu1 }
 0xdf7   :  { %v3396_v17 = vpop.f32.mrb[53].mxu1  ;;  %v3535_v31 = vsel %vm68_vm0, %v5452_v19, -inf }
 0xdf8   :  { %3536 = vmax.xlane.f32.xlu0 %v3535_v31  ;;  %v3532_v34 = vsel %vm68_vm0, %v3396_v17, -inf }
 0xdf9   :  { %3533 = vmax.xlane.f32.xlu1 %v3532_v34 }
 0xdfa   :  { %v5455_v35 = vpop.f32.mrb[54].mxu1 }
 0xdfb   :  { %v3406_v23 = vpop.f32.mrb[55].mxu1  ;;  %v3541_v38 = vsel %vm68_vm0, %v5455_v35, -inf }
 0xdfc   :  { %3542 = vmax.xlane.f32.xlu0 %v3541_v38  ;;  %v3538_v0 = vsel %vm68_vm0, %v3406_v23, -inf }
 0xdfd   :  { %3539 = vmax.xlane.f32.xlu1 %v3538_v0 }
 0xe06   :  { %v5466_v24 = vpop.f32.mrb[56].mxu1 }
 0xe07   :  { %v3513_v25 = vpop.f32.mrb[57].mxu1  ;;  %v3547_v8 = vsel %vm68_vm0, %v5466_v24, -inf }
 0xe08   :  { %3548 = vmax.xlane.f32.xlu0 %v3547_v8  ;;  %v3544_v63 = vsel %vm68_vm0, %v3513_v25, -inf }
 0xe09   :  { %3545 = vmax.xlane.f32.xlu1 %v3544_v63 }
 0xe0a   :  { %v5469_v6 = vpop.f32.mrb[58].mxu1 }
 0xe0b   :  { %v6883_v1 = vpop.f32.mrb[59].mxu1  ;;  %v3553_v7 = vsel %vm68_vm0, %v5469_v6, -inf }
 0xe0c   :  { %3554 = vmax.xlane.f32.xlu0 %v3553_v7  ;;  %v3550_v27 = vsel %vm68_vm0, %v6883_v1, -inf }
 0xe10   :  { %3551 = vmax.xlane.f32.xlu0 %v3550_v27 }
 0xe1a   :  { %5914 = vrot.lane.b32.xlu1 %v6512_v53, %s6218_s9 }
 0xe1e   :  { %5919 = vrot.lane.b32.xlu1 %v6524_v57, %s6218_s9 }
 0xe22   :  { %5924 = vrot.lane.b32.xlu1 %v6540_v60, %s6218_s9 }
 0xe26   :  { %3839 = vrot.lane.b32.xlu1 %v6130_v28, %s6217_s8  ;;  %5909 = vrot.lane.b32.xlu0 %v6500_v49, %s6218_s9 }
 0xe2a   :  { %5934 = vrot.lane.b32.xlu1 %v6512_v53, %s6219_s10  ;;  %5929 = vrot.lane.b32.xlu0 %v6500_v49, %s6219_s10 }
 0xe2e   :  { %5944 = vrot.lane.b32.xlu1 %v6540_v60, %s6219_s10  ;;  %5939 = vrot.lane.b32.xlu0 %v6524_v57, %s6219_s10 }
 0xe32   :  { %3981 = vrot.lane.b32.xlu1 %v6493_v45, %s6220_s11  ;;  %3979 = vrot.lane.b32.xlu0 %v6496_v47, %s6220_s11 }
 0xe36   :  { %3985 = vrot.lane.b32.xlu1 %v6503_v50, %s6220_s11  ;;  %3983 = vrot.lane.b32.xlu0 %v6506_v51, %s6220_s11 }
 0xe85   :  { %v3537_v4 = vpop.xlane.xlu0 %3536 }
 0xe86   :  { %v3557_v29 = vsub.f32 %v5452_v19, %v3537_v4  ;;  %v3534_v61 = vpop.xlane.xlu1 %3533 }
 0xe87   :  { %v3556_v21 = vsub.f32 %v3396_v17, %v3534_v61 }
 0xe88   :  { %v3566_v33 = vmul.f32 1.442695, %v3557_v29 }
 0xe89   :  { %v3564_v22 = vmul.f32 1.442695, %v3556_v21  ;;  %v3543_v40 = vpop.xlane.xlu0 %3542 }
 0xe8a   :  { %6066 = vpow2.f32 %v3566_v33  ;;  %v3559_v30 = vsub.f32 %v5455_v35, %v3543_v40  ;;  %v3540_v55 = vpop.xlane.xlu1 %3539 }
 0xe8b   :  { %6068 = vpow2.f32 %v3564_v22  ;;  %v3558_v45 = vsub.f32 %v3406_v23, %v3540_v55 }
 0xe8c   :  { %v3570_v12 = vmul.f32 1.442695, %v3559_v30 }
 0xe8d   :  { %v3568_v47 = vmul.f32 1.442695, %v3558_v45 }
 0xe8e   :  { %6070 = vpow2.f32 %v3570_v12 }
 0xe8f   :  { %6072 = vpow2.f32 %v3568_v47 }
 0xe94   :  { %v6913_v50 = vpop.eup %6066 }
 0xe95   :  { %v6069_v52 = vpop.eup %6068  ;;  %v3549_v51 = vpop.xlane.xlu0 %3548  ;;  %v3583_v39 = vsel %vm68_vm0, %v6913_v50, 0.0 }
 0xe96   :  { %v3561_v41 = vsub.f32 %v5466_v24, %v3549_v51  ;;  %v3546_v26 = vpop.xlane.xlu1 %3545  ;;  %5478 = vmatprep.mubr.msk.f32.mxu0 %vm68_vm0, %v6069_v52  ;;  %3584 = vadd.xlane.f32.xlu0 %v3583_v39  ;;  %v3580_v20 = vsel %vm68_vm0, %v6069_v52, 0.0 }
 0xe97   :  { %v3560_v62 = vsub.f32 %v3513_v25, %v3546_v26  ;;  %3581 = vadd.xlane.f32.xlu1 %v3580_v20 }
 0xe98   :  { %v6919_v3 = vpop.eup %6070  ;;  %v3574_v32 = vmul.f32 1.442695, %v3561_v41 }
 0xe99   :  { %v6921_v15 = vpop.eup %6072  ;;  %v3572_v44 = vmul.f32 1.442695, %v3560_v62  ;;  %v3555_v19 = vpop.xlane.xlu0 %3554  ;;  %v3589_v17 = vsel %vm68_vm0, %v6919_v3, 0.0 }
 0xe9a   :  { %6074 = vpow2.f32 %v3574_v32  ;;  %v3563_v31 = vsub.f32 %v5469_v6, %v3555_v19  ;;  %v5915_v34 = vpop.permute.xlu1 %5914  ;;  %v3586_v35 = vsel %vm68_vm0, %v6921_v15, 0.0 }
 0xe9b   :  { %6076 = vpow2.f32 %v3572_v44  ;;  %3590 = vadd.xlane.f32.xlu1 %v3589_v17  ;;  %3587 = vadd.xlane.f32.xlu0 %v3586_v35  ;;  %v5917_v29 = vunpack.i.h.bf16 %v5915_v34  ;;  %v5916_v61 = vunpack.i.l.bf16 %v5915_v34 }
 0xe9c   :  { %v3578_v23 = vmul.f32 1.442695, %v3563_v31 }
 0xe9d   :  { %v3552_v38 = vpop.xlane.xlu0 %3551  ;;  %v5706_v39 = vpack.c.bf16 %v5917_v29, %v5916_v61 }
 0xe9e   :  { %6078 = vpow2.f32 %v3578_v23  ;;  %v3562_v0 = vsub.f32 %v6883_v1, %v3552_v38  ;;  %v5920_v24 = vpop.permute.xlu1 %5919 }
 0xe9f   :  { %v5922_v25 = vunpack.i.h.bf16 %v5920_v24  ;;  %v5921_v8 = vunpack.i.l.bf16 %v5920_v24 }
 0xea0   :  { %v3576_v63 = vmul.f32 1.442695, %v3562_v0 }
 0xea1   :  { %v5710_v7 = vpack.c.bf16 %v5922_v25, %v5921_v8  ;;  %v5910_v27 = vpop.permute.xlu0 %5909 }
 0xea2   :  { %6080 = vpow2.f32 %v3576_v63  ;;  %v5912_v6 = vunpack.i.h.bf16 %v5910_v27  ;;  %v5911_v28 = vunpack.i.l.bf16 %v5910_v27  ;;  %v5925_v4 = vpop.permute.xlu1 %5924 }
 0xea3   :  { %v5927_v21 = vunpack.i.h.bf16 %v5925_v4  ;;  %v5926_v33 = vunpack.i.l.bf16 %v5925_v4  ;;  %5711 = vmatprep.subr.bf16.mxu1 %v5710_v7 }
 0xea4   :  { %v6075_v22 = vpop.eup %6074  ;;  %v5702_v40 = vpack.c.bf16 %v5912_v6, %v5911_v28  ;;  %5713 = vmatpush3.bf16.msra.mxu1 %v5710_v7 }
 0xea5   :  { %v6077_v30 = vpop.eup %6076  ;;  %v5714_v1 = vpack.c.bf16 %v5927_v21, %v5926_v33  ;;  %v5930_v55 = vpop.permute.xlu0 %5929  ;;  %v3595_v45 = vsel %vm68_vm0, %v6075_v22, 0.0 }
 0xea6   :  { %v5932_v12 = vunpack.i.h.bf16 %v5930_v55  ;;  %v5931_v47 = vunpack.i.l.bf16 %v5930_v55  ;;  %3596 = vadd.xlane.f32.xlu1 %v3595_v45  ;;  %5492 = vmatprep.mubr.msk.f32.mxu1 %vm68_vm0, %v6077_v30  ;;  %v3840_v52 = vpop.permute.xlu1 %3839  ;;  %v3592_v51 = vsel %vm68_vm0, %v6077_v30, 0.0 }
 0xea7   :  { %5703 = vmatprep.subr.bf16.mxu0 %v5702_v40  ;;  %5715 = vmatprep.subr.bf16.mxu1 %v5714_v1 }
 0xea8   :  { %v6079_v41 = vpop.eup %6078  ;;  %v5718_v26 = vpack.c.bf16 %v5932_v12, %v5931_v47  ;;  %3593 = vadd.xlane.f32.xlu0 %v3592_v51  ;;  %5705 = vmatpush3.bf16.msra.mxu0 %v5702_v40 }
 0xea9   :  { %5707 = vmatprep.subr.bf16.mxu0 %v5706_v39  ;;  %5717 = vmatpush3.bf16.msra.mxu1 %v5714_v1  ;;  %v5940_v20 = vpop.permute.xlu0 %5939  ;;  %v3601_v62 = vsel %vm68_vm0, %v6079_v41, 0.0 }
 0xeaa   :  { %v5935_v32 = vpop.permute.xlu1 %5934  ;;  %3602 = vadd.xlane.f32.xlu1 %v3601_v62  ;;  %5720 = vmatprep.subr.msk.bf16.mxu1 %vm6556_vm3, %v5718_v26  ;;  %v5942_v19 = vunpack.i.h.bf16 %v5940_v20  ;;  %v5941_v17 = vunpack.i.l.bf16 %v5940_v20 }
 0xeab   :  { %v5937_v31 = vunpack.i.h.bf16 %v5935_v32  ;;  %v5936_v34 = vunpack.i.l.bf16 %v5935_v32 }
 0xeac   :  { %v6081_v44 = vpop.eup %6080  ;;  %5709 = vmatpush3.bf16.msra.mxu0 %v5706_v39  ;;  %5493 = vmatmul.mubr.msk.f32.vlgmr.msra.gmra.mrb[60].mxu1 %vm68_vm0, %v6075_v22  ;;  %v6939_v23 = vpack.c.bf16 %v5942_v19, %v5941_v17 }
 0xead   :  { %5495 = vmatprep.mubr.msk.f32.mxu1 %vm68_vm0, %v6081_v44  ;;  %v3598_v35 = vsel %vm68_vm0, %v6081_v44, 0.0  ;;  %5498 = vmatprep.subr.mxu0 %v3840_v52  ;;  %v3980_v38 = vpop.permute.xlu0 %3979  ;;  %v5724_v0 = vpack.c.bf16 %v5937_v31, %v5936_v34 }
 0xeae   :  { %3599 = vadd.xlane.f32.xlu0 %v3598_v35 }
 0xeaf   :  { %5479 = vmatmul.mubr.msk.f32.vlgmr.msra.gmra.mrb[40].mxu0 %vm68_vm0, %v6913_v50  ;;  %v5945_v50 = vpop.permute.xlu1 %5944 }
 0xeb0   :  { %5481 = vmatprep.mubr.msk.f32.mxu0 %vm68_vm0, %v6921_v15  ;;  %5496 = vmatmul.mubr.msk.f32.gmra.mrb[62].mxu1 %vm68_vm0, %v6079_v41  ;;  %v5947_v55 = vunpack.i.h.bf16 %v5945_v50  ;;  %v5946_v45 = vunpack.i.l.bf16 %v5945_v50 }
 0xeb1   :  { %5499 = vmatpush3.msra.mxu0 %v3840_v52  ;;  %5520 = vmatprep.mubr.msk.f32.mxu1 %vm153_vm2, %v3980_v38  ;;  %v3984_v24 = vpop.permute.xlu0 %3983 }
 0xeb2   :  { %5732 = vmatprep.subr.msk.bf16.mxu0 %vm6556_vm3, %v6939_v23  ;;  %5723 = vmatpush3.bf16.xpose.msk.msra.mxu1 %vm6556_vm3, %v5718_v26  ;;  %v5736_v44 = vpack.c.bf16 %v5947_v55, %v5946_v45 }
 0xeb3   :  { %5482 = vmatmul.mubr.msk.f32.gmra.mrb[42].mxu0 %vm68_vm0, %v6919_v3  ;;  %5726 = vmatprep.subr.msk.bf16.mxu1 %vm6556_vm3, %v5724_v0  ;;  %v3982_v15 = vpop.permute.xlu1 %3981 }
 0xeb7   :  { %v3986_v3 = vpop.permute.xlu1 %3985 }
 0xeba   :  { %5729 = vmatpush3.bf16.xpose.msk.msra.mxu1 %vm6556_vm3, %v5724_v0 }
 0xebb   :  { %4098 = vrot.lane.b32.xlu1 %v6515_v54, %s6220_s11 }
 0xebf   :  { %4102 = vrot.lane.b32.xlu1 %v6529_v59, %s6220_s11 }
 0xec1   :  { %5521 = vmatmul.mubr.msk.f32.vlgmr.msra.gmra.mrb[64].mxu1 %vm153_vm2, %v3982_v15 }
 0xec2   :  { %5523 = vmatprep.mubr.msk.f32.mxu1 %vm153_vm2, %v3984_v24 }
 0xec3   :  { %5949 = vrot.lane.b32.xlu1 %v6500_v49, %s6221_s12 }
 0xec4   :  { %4096 = vrot.lane.b32.xlu0 %v6518_v56, %s6220_s11 }
 0xec5   :  { %5524 = vmatmul.mubr.msk.f32.gmra.mrb[66].mxu1 %vm153_vm2, %v3986_v3 }
 0xec8   :  { %4100 = vrot.lane.b32.xlu0 %v6536_v2, %s6220_s11 }
 0xf23   :  { %v3585_v56 = vpop.xlane.xlu0 %3584 }
 0xf24   :  { %v3582_v54 = vpop.xlane.xlu1 %3581 }
 0xf28   :  { %v3591_v25 = vpop.xlane.xlu1 %3590  ;;  %v3588_v4 = vpop.xlane.xlu0 %3587 }
 0xf33   :  { %v3597_v59 = vpop.xlane.xlu1 %3596 }
 0xf34   :  { %6082 = vrcp.f32 %v3597_v59 }
 0xf35   :  { %6084 = vrcp.f32 %v3582_v54  ;;  %v3594_v2 = vpop.xlane.xlu0 %3593 }
 0xf37   :  { %v3603_v8 = vpop.xlane.xlu1 %3602 }
 0xf38   :  { %6086 = vrcp.f32 %v3603_v8 }
 0xf39   :  { %6088 = vrcp.f32 %v3585_v56 }
 0xf3a   :  { %6090 = vrcp.f32 %v3591_v25 }
 0xf3b   :  { %v6969_v63 = vpop.permute.xlu1 %4098  ;;  %6092 = vrcp.f32 %v3588_v4  ;;  %v3600_v21 = vpop.xlane.xlu0 %3599 }
 0xf3c   :  { %6094 = vrcp.f32 %v3594_v2 }
 0xf3d   :  { %6096 = vrcp.f32 %v3600_v21 }
 0xf3e   :  { %v6083_v29 = vpop.eup %6082 }
 0xf3f   :  { %v6971_v7 = vpop.permute.xlu1 %4102  ;;  %v6085_v40 = vpop.eup %6084 }
 0xf42   :  { %v6087_v1 = vpop.eup %6086 }
 0xf43   :  { %v5950_v27 = vpop.permute.xlu1 %5949  ;;  %v6089_v52 = vpop.eup %6088 }
 0xf44   :  { %v5952_v6 = vunpack.i.h.bf16 %v5950_v27  ;;  %v5951_v49 = vunpack.i.l.bf16 %v5950_v27  ;;  %v6091_v20 = vpop.eup %6090 }
 0xf45   :  { %v6093_v32 = vpop.eup %6092 }
 0xf46   :  { %v5742_v28 = vpack.c.bf16 %v5952_v6, %v5951_v49  ;;  %v6095_v34 = vpop.eup %6094 }
 0xf47   :  { %v6097_v38 = vpop.eup %6096 }
 0xf48   :  { %5743 = vmatprep.subr.bf16.mxu1 %v5742_v28 }
 0xf49   :  { %5745 = vmatpush3.bf16.msra.mxu1 %v5742_v28 }
 0xf7f   :  { %v5494_v61 = vpop.f32.mrb[60].mxu1 }
 0xf80   :  { %v3835_v33 = vmul.f32 %v6083_v29, %v5494_v61  ;;  %v3803_v22 = vpop.f32.mrb[61].mxu1 }
 0xf81   :  { %v3834_v35 = vmul.f32 %v6095_v34, %v3803_v22 }
 0xf82   :  { %v5480_v30 = vpop.f32.mrb[40].mxu0 }
 0xf83   :  { %v3694_v12 = vpop.f32.mrb[41].mxu0  ;;  %v5497_v47 = vpop.f32.mrb[62].mxu1  ;;  %v3831_v26 = vmul.f32 %v6089_v52, %v5480_v30 }
 0xf84   :  { %v3830_v51 = vmul.f32 %v6085_v40, %v3694_v12  ;;  %v3837_v39 = vmul.f32 %v6087_v1, %v5497_v47  ;;  %v3813_v41 = vpop.f32.mrb[63].mxu1 }
 0xf85   :  { %v3836_v0 = vmul.f32 %v6097_v38, %v3813_v41  ;;  %v6222_v41 = vmov 0  }
 0xf86   :  { %v5483_v62 = vpop.f32.mrb[42].mxu0  ;;  %5500 = vmatprep.mubr.msk.f32.mxu0 %vm153_vm2, %v3830_v51  ;;  %5969 = vset.pattern.permute.xlu1 %v6222_v41 }
 0xf87   :  { %v3833_v19 = vmul.f32 %v6091_v20, %v5483_v62  ;;  %v3704_v17 = vpop.f32.mrb[43].mxu0  ;;  %5501 = vmatmul.mubr.msk.f32.vlgmr.msra.gmra.mrb[32].mxu0 %vm153_vm2, %v3831_v26  ;;  %5968 = vset.pattern.permute.xlu0 %v6222_v41 }
 0xf88   :  { %v3832_v31 = vmul.f32 %v6093_v32, %v3704_v17  ;;  %5735 = vmatpush3.bf16.xpose.msk.msra.mxu0 %vm6556_vm3, %v6939_v23  ;;  %v4097_v23 = vpop.permute.xlu0 %4096 }
 0xf89   :  { %5738 = vmatprep.subr.msk.bf16.mxu0 %vm6556_vm3, %v5736_v44 }
 0xf8a   :  { %5503 = vmatprep.mubr.msk.f32.mxu0 %vm153_vm2, %v3832_v31 }
 0xf8b   :  { %5504 = vmatmul.mubr.msk.f32.gmra.mrb[34].mxu0 %vm153_vm2, %v3833_v19 }
 0xf8c   :  { %5506 = vmatprep.mubr.msk.f32.mxu0 %vm153_vm2, %v3834_v35  ;;  %v4101_v54 = vpop.permute.xlu0 %4100 }
 0xf8f   :  { %5507 = vmatmul.mubr.msk.f32.gmra.mrb[36].mxu0 %vm153_vm2, %v3835_v33 }
 0xf90   :  { %5741 = vmatpush3.bf16.xpose.msk.msra.mxu0 %vm6556_vm3, %v5736_v44  ;;  %5509 = vmatprep.mubr.msk.f32.mxu0 %vm153_vm2, %v3836_v0 }
 0xf93   :  { %5510 = vmatmul.mubr.msk.f32.gmra.mrb[38].mxu0 %vm153_vm2, %v3837_v39 }
 0xf94   :  { %v5522_v50 = vpop.f32.mrb[64].mxu1  ;;  %5534 = vmatprep.mubr.msk.f32.mxu0 %vm153_vm2, %v4097_v23 }
 0xf95   :  { %v4077_v15 = vpop.f32.mrb[65].mxu1  ;;  %v4216_v24 = vsel %vm68_vm0, %v5522_v50, -inf }
 0xf96   :  { %4217 = vmax.xlane.f32.xlu1 %v4216_v24  ;;  %v4213_v3 = vsel %vm68_vm0, %v4077_v15, -inf }
 0xf97   :  { %4214 = vmax.xlane.f32.xlu0 %v4213_v3  ;;  %5535 = vmatmul.mubr.msk.f32.vlgmr.msra.gmra.mrb[44].mxu0 %vm153_vm2, %v6969_v63 }
 0xf98   :  { %v5525_v5 = vpop.f32.mrb[66].mxu1  ;;  %5537 = vmatprep.mubr.msk.f32.mxu0 %vm153_vm2, %v4101_v54 }
 0xf99   :  { %v4087_v25 = vpop.f32.mrb[67].mxu1  ;;  %v4222_v59 = vsel %vm68_vm0, %v5525_v5, -inf }
 0xf9a   :  { %v4219_v8 = vsel %vm68_vm0, %v4087_v25, -inf }
 0xf9b   :  { %4223 = vmax.xlane.f32.xlu0 %v4222_v59  ;;  %5538 = vmatmul.mubr.msk.f32.gmra.mrb[46].mxu0 %vm153_vm2, %v6971_v7 }
 0xf9f   :  { %4220 = vmax.xlane.f32.xlu0 %v4219_v8 }
0x1023   :  { %v4218_v52 = vpop.xlane.xlu1 %4217 }
0x1024   :  { %v4215_v27 = vpop.xlane.xlu0 %4214  ;;  %v4238_v51 = vsub.f32 %v5522_v50, %v4218_v52 }
0x1025   :  { %v4237_v6 = vsub.f32 %v4077_v15, %v4215_v27 }
0x1026   :  { %v4247_v39 = vmul.f32 1.442695, %v4238_v51 }
0x1027   :  { %v4245_v49 = vmul.f32 1.442695, %v4237_v6 }
0x1028   :  { %v4224_v21 = vpop.xlane.xlu0 %4223 }
0x1029   :  { %6098 = vpow2.f32 %v4245_v49  ;;  %v4240_v40 = vsub.f32 %v5525_v5, %v4224_v21 }
0x102b   :  { %v4251_v1 = vmul.f32 1.442695, %v4240_v40  ;;  %v4675_v40 = vld [vmem:[%s7094_s4 + $0x18] sm:$0xff] }
0x102c   :  { %v4221_v33 = vpop.xlane.xlu0 %4220 }
0x102d   :  { %v4239_v22 = vsub.f32 %v4087_v25, %v4221_v33  ;;  %v6131_v33 = vld [vmem:[#allocation6 + $0x38] sm:$0xff] }
0x102f   :  { %v4249_v30 = vmul.f32 1.442695, %v4239_v22  ;;  %v4674_v22 = vld [vmem:[%s7094_s4 + $0x10] sm:$0xff] }
0x1031   :  { %6100 = vpow2.f32 %v4249_v30  ;;  %v4672_v30 = vld [vmem:[%s7094_s4] sm:$0xff] }
0x1032   :  { %6102 = vpow2.f32 %v4251_v1 }
0x1033   :  { %v6099_v28 = vpop.eup %6098  ;;  %6104 = vpow2.f32 %v4247_v39 }
0x1034   :  { %5548 = vmatprep.mubr.msk.f32.mxu1 %vm68_vm0, %v6099_v28  ;;  %v4261_v45 = vsel %vm68_vm0, %v6099_v28, 0.0 }
0x103b   :  { %v6101_v12 = vpop.eup %6100 }
0x103c   :  { %v6103_v47 = vpop.eup %6102 }
0x103d   :  { %v6105_v26 = vpop.eup %6104 }
0x103e   :  { %v4264_v20 = vsel %vm68_vm0, %v6105_v26, 0.0 }
0x106a   :  { %v5536_v63 = vpop.f32.mrb[44].mxu0 }
0x106b   :  { %v4194_v56 = vpop.f32.mrb[45].mxu0  ;;  %v4228_v4 = vsel %vm68_vm0, %v5536_v63, -inf }
0x106c   :  { %4229 = vmax.xlane.f32.xlu0 %v4228_v4  ;;  %v4225_v2 = vsel %vm68_vm0, %v4194_v56, -inf }
0x106d   :  { %4226 = vmax.xlane.f32.xlu1 %v4225_v2 }
0x106e   :  { %v5539_v29 = vpop.f32.mrb[46].mxu0 }
0x106f   :  { %v7001_v7 = vpop.f32.mrb[47].mxu0  ;;  %v4234_v61 = vsel %vm68_vm0, %v5539_v29, -inf }
0x1070   :  { %4235 = vmax.xlane.f32.xlu0 %v4234_v61  ;;  %v4231_v55 = vsel %vm68_vm0, %v7001_v7, -inf }
0x107e   :  { %5959 = vrot.lane.b32.xlu1 %v6524_v57, %s6221_s12  ;;  %v4267_v57 = vsel %vm68_vm0, %v6101_v12, 0.0 }
0x1086   :  { %5954 = vrot.lane.b32.xlu0 %v6512_v53, %s6221_s12  ;;  %v4270_v53 = vsel %vm68_vm0, %v6103_v47, 0.0 }
0x10a2   :  { %4232 = vmax.xlane.f32.xlu1 %v4231_v55 }
0x10a5   :  { %4262 = vadd.xlane.f32.xlu0 %v4261_v45 }
0x10a9   :  { %4268 = vadd.xlane.f32.xlu0 %v4267_v57 }
0x10ad   :  { %4271 = vadd.xlane.f32.xlu0 %v4270_v53 }
0x10b3   :  { %5964 = vrot.lane.b32.xlu1 %v6540_v60, %s6221_s12 }
0x10d7   :  { %4265 = vadd.xlane.f32.xlu1 %v4264_v20 }
0x10f9   :  { %v4230_v62 = vpop.xlane.xlu0 %4229 }
0x10fa   :  { %v4242_v32 = vsub.f32 %v5536_v63, %v4230_v62  ;;  %v4227_v44 = vpop.xlane.xlu1 %4226 }
0x10fb   :  { %v4241_v19 = vsub.f32 %v4194_v56, %v4227_v44 }
0x10fc   :  { %v4255_v17 = vmul.f32 1.442695, %v4242_v32 }
0x10fd   :  { %v4253_v31 = vmul.f32 1.442695, %v4241_v19  ;;  %v4236_v34 = vpop.xlane.xlu0 %4235 }
0x10fe   :  { %6106 = vpow2.f32 %v4255_v17  ;;  %v4244_v60 = vsub.f32 %v5539_v29, %v4236_v34  ;;  %v5960_v35 = vpop.permute.xlu1 %5959 }
0x10ff   :  { %6108 = vpow2.f32 %v4253_v31  ;;  %v5962_v38 = vunpack.i.h.bf16 %v5960_v35  ;;  %v5961_v0 = vunpack.i.l.bf16 %v5960_v35 }
0x1100   :  { %v4259_v23 = vmul.f32 1.442695, %v4244_v60 }
0x1101   :  { %v5750_v50 = vpack.c.bf16 %v5962_v38, %v5961_v0  ;;  %v5955_v15 = vpop.permute.xlu0 %5954 }
0x1102   :  { %6110 = vpow2.f32 %v4259_v23  ;;  %v5957_v24 = vunpack.i.h.bf16 %v5955_v15  ;;  %v5956_v3 = vunpack.i.l.bf16 %v5955_v15 }
0x1103   :  { %5751 = vmatprep.subr.bf16.mxu0 %v5750_v50 }
0x1104   :  { %v5746_v54 = vpack.c.bf16 %v5957_v24, %v5956_v3  ;;  %5753 = vmatpush3.bf16.msra.mxu0 %v5750_v50 }
0x1106   :  { %5747 = vmatprep.subr.bf16.mxu1 %v5746_v54 }
0x1107   :  { %5749 = vmatpush3.bf16.msra.mxu1 %v5746_v54 }
0x1108   :  { %v6107_v5 = vpop.eup %6106 }
0x1109   :  { %v6109_v25 = vpop.eup %6108  ;;  %v4276_v59 = vsel %vm68_vm0, %v6107_v5, 0.0 }
0x110a   :  { %5562 = vmatprep.mubr.msk.f32.mxu0 %vm68_vm0, %v6109_v25  ;;  %4277 = vadd.xlane.f32.xlu0 %v4276_v59  ;;  %v4273_v8 = vsel %vm68_vm0, %v6109_v25, 0.0 }
0x110b   :  { %5549 = vmatmul.mubr.msk.f32.vlgmr.msra.gmra.mrb[68].mxu1 %vm68_vm0, %v6105_v26  ;;  %4274 = vadd.xlane.f32.xlu1 %v4273_v8 }
0x110c   :  { %v6111_v27 = vpop.eup %6110  ;;  %5551 = vmatprep.mubr.msk.f32.mxu1 %vm68_vm0, %v6101_v12 }
0x110d   :  { %v4282_v6 = vsel %vm68_vm0, %v6111_v27, 0.0 }
0x110e   :  { %4283 = vadd.xlane.f32.xlu0 %v4282_v6 }
0x110f   :  { %5552 = vmatmul.mubr.msk.f32.gmra.mrb[70].mxu1 %vm68_vm0, %v6103_v47 }
0x1124   :  { %4678 = vperm.xlu0 %5968, %v4672_v30  }
0x112f   :  { %v4233_v49 = vpop.xlane.xlu1 %4232 }
0x1130   :  { %v4243_v28 = vsub.f32 %v7001_v7, %v4233_v49  ;;  %v4673_v7 = vld [vmem:[%s7094_s4 + $0x8] sm:$0xff] }
0x1132   :  { %v4257_v63 = vmul.f32 1.442695, %v4243_v28  ;;  %v4263_v45 = vpop.xlane.xlu0 %4262 }
0x1133   :  { %v5965_v56 = vpop.permute.xlu1 %5964 }
0x1134   :  { %6112 = vpow2.f32 %v4257_v63  ;;  %v5967_v4 = vunpack.i.h.bf16 %v5965_v56  ;;  %v5966_v2 = vunpack.i.l.bf16 %v5965_v56 }
0x1135   :  { %6114 = vrcp.f32 %v4263_v45 }
0x1136   :  { %v5754_v29 = vpack.c.bf16 %v5967_v4, %v5966_v2  ;;  %v4269_v57 = vpop.xlane.xlu0 %4268 }
0x1138   :  { %5755 = vmatprep.subr.bf16.mxu0 %v5754_v29 }
0x1139   :  { %5757 = vmatpush3.bf16.msra.mxu0 %v5754_v29 }
0x113a   :  { %v4272_v53 = vpop.xlane.xlu0 %4271 }
0x113c   :  { %5563 = vmatmul.mubr.msk.f32.vlgmr.msra.gmra.mrb[48].mxu0 %vm68_vm0, %v6107_v5 }
0x113e   :  { %v6113_v61 = vpop.eup %6112 }
0x113f   :  { %5565 = vmatprep.mubr.msk.f32.mxu0 %vm68_vm0, %v6113_v61  ;;  %v4279_v21 = vsel %vm68_vm0, %v6113_v61, 0.0 }
0x1140   :  { %4280 = vadd.xlane.f32.xlu1 %v4279_v21  ;;  %5566 = vmatmul.mubr.msk.f32.gmra.mrb[50].mxu0 %vm68_vm0, %v6111_v27 }
0x1151   :  { %4520 = vrot.lane.b32.xlu1 %v6131_v33, %s6217_s8 }
0x1155   :  { %4683 = vperm.xlu1 %5969, %v4673_v7  }
0x1159   :  { %4688 = vperm.xlu1 %5969, %v4674_v22  }
0x115d   :  { %4693 = vperm.xlu1 %5969, %v4675_v40  }
0x1161   :  { %4661 = vrot.lane.b32.xlu1 %v6489_v43, %s6217_s8 }
0x1164   :  { %v4266_v1 = vpop.xlane.xlu1 %4265 }
0x1165   :  { %1814 = vrot.lane.b32.xlu1 %v6319_v13, %s6217_s8  ;;  %6116 = vrcp.f32 %v4266_v1  ;;  %v6115_v13 = vpop.eup %6114 }
0x1166   :  { %6118 = vrcp.f32 %v4269_v57 }
0x1167   :  { %6120 = vrcp.f32 %v4272_v53 }
0x116f   :  { %v6117_v51 = vpop.eup %6116 }
0x1170   :  { %v6119_v20 = vpop.eup %6118 }
0x1171   :  { %v6121_v32 = vpop.eup %6120 }
0x1197   :  { %v4278_v17 = vpop.xlane.xlu0 %4277 }
0x1198   :  { %v4275_v55 = vpop.xlane.xlu1 %4274 }
0x1199   :  { %6122 = vrcp.f32 %v4275_v55 }
0x119a   :  { %6124 = vrcp.f32 %v4278_v17 }
0x119b   :  { %v4284_v31 = vpop.xlane.xlu0 %4283 }
0x11a3   :  { %v6123_v60 = vpop.eup %6122  ;;  %v4679_v4 = vpop.permute.xlu0 %4678 }
0x11a4   :  { %v6125_v38 = vpop.eup %6124 }
0x11cd   :  { %v4281_v12 = vpop.xlane.xlu1 %4280 }
0x11ce   :  { %6126 = vrcp.f32 %v4281_v12 }
0x11cf   :  { %6128 = vrcp.f32 %v4284_v31 }
0x11d1   :  { %v4521_v47 = vpop.permute.xlu1 %4520 }
0x11d2   :  { %5568 = vmatprep.subr.mxu0 %v4521_v47 }
0x11d3   :  { %5569 = vmatpush3.msra.mxu0 %v4521_v47 }
0x11d5   :  { %v4684_v25 = vpop.permute.xlu1 %4683 }
0x11d8   :  { %v6127_v15 = vpop.eup %6126 }
0x11d9   :  { %v6129_v3 = vpop.eup %6128  ;;  %v4689_v59 = vpop.permute.xlu1 %4688 }
0x11dd   :  { %v4694_v8 = vpop.permute.xlu1 %4693 }
0x11de   :  { %v5550_v43 = vpop.f32.mrb[68].mxu1 }
0x11df   :  { %v4375_v52 = vpop.f32.mrb[69].mxu1  ;;  %v4512_v41 = vmul.f32 %v6117_v51, %v5550_v43 }
0x11e0   :  { %v4511_v39 = vmul.f32 %v6115_v13, %v4375_v52 }
0x11e1   :  { %v4662_v28 = vpop.permute.xlu1 %4661 }
0x11e2   :  { %v5553_v26 = vpop.f32.mrb[70].mxu1  ;;  %5570 = vmatprep.mubr.msk.f32.mxu0 %vm153_vm2, %v4511_v39 }
0x11e3   :  { %v4385_v62 = vpop.f32.mrb[71].mxu1  ;;  %5571 = vmatmul.mubr.msk.f32.vlgmr.msra.gmra.mrb[32].mxu0 %vm153_vm2, %v4512_v41  ;;  %v4514_v19 = vmul.f32 %v6121_v32, %v5553_v26 }
0x11e4   :  { %v4513_v44 = vmul.f32 %v6119_v20, %v4385_v62 }
0x11e6   :  { %5573 = vmatprep.mubr.msk.f32.mxu0 %vm153_vm2, %v4513_v44 }
0x11e7   :  { %5574 = vmatmul.mubr.msk.f32.gmra.mrb[34].mxu0 %vm153_vm2, %v4514_v19 }
0x120f   :  { %v5564_v34 = vpop.f32.mrb[48].mxu0 }
0x1210   :  { %v4484_v35 = vpop.f32.mrb[49].mxu0  ;;  %v4516_v23 = vmul.f32 %v6125_v38, %v5564_v34 }
0x1211   :  { %v4515_v0 = vmul.f32 %v6123_v60, %v4484_v35 }
0x1213   :  { %v5567_v50 = vpop.f32.mrb[50].mxu0  ;;  %5576 = vmatprep.mubr.msk.f32.mxu0 %vm153_vm2, %v4515_v0 }
0x1214   :  { %v4494_v24 = vpop.f32.mrb[51].mxu0  ;;  %5577 = vmatmul.mubr.msk.f32.gmra.mrb[36].mxu0 %vm153_vm2, %v4516_v23  ;;  %v4518_v5 = vmul.f32 %v6129_v3, %v5567_v50 }
0x1215   :  { %v4517_v54 = vmul.f32 %v6127_v15, %v4494_v24 }
0x1217   :  { %5579 = vmatprep.mubr.msk.f32.mxu0 %vm153_vm2, %v4517_v54 }
0x1218   :  { %5580 = vmatmul.mubr.msk.f32.gmra.mrb[38].mxu0 %vm153_vm2, %v4518_v5 }
0x12b6   :  { %v5572_v27 = vpop.f32.mrb[32].mxu0 }
0x12b7   :  { %v5758_v6 = vadd.f32 %v5572_v27, %v6861_v42  ;;  %v4613_v49 = vpop.f32.mrb[33].mxu0 }
0x12b8   :  { %v5759_v63 = vadd.f32 %v4613_v49, %v6863_v48 }
0x12b9   :  { %v4665_v56 = vadd.f32 %v5758_v6, %v4662_v28 }
0x12ba   :  { %v4664_v2 = vadd.f32 %v5759_v63, %v4662_v28  ;;  %v5575_v29 = vpop.f32.mrb[34].mxu0 }
0x12bb   :  { %v4697_v61 = vmul.f32 %v4684_v25, %v4665_v56  ;;  %v5760_v21 = vadd.f32 %v5575_v29, %v6865_v58  ;;  %v4623_v33 = vpop.f32.mrb[35].mxu0 }
0x12bc   :  { %v4696_v7 = vmul.f32 %v4679_v4, %v4664_v2  ;;  %v5761_v22 = vadd.f32 %v4623_v33, %v6867_v36  ;;  %v1815_v36 = vpop.permute.xlu1 %1814 }
0x12bd   :  { %v4667_v40 = vadd.f32 %v5760_v21, %v4662_v28  ;;  %v4705_v30 = vsel %vm68_vm0, %v4697_v61, 0.0  ;;  %v1817_v39 = vadd.f32 %v1815_v36, %v6602_v14  ;;  %v1818_v56 = vadd.f32 %v6600_v11, %v1815_v36 }
0x12be   :  { %v4704_v42 = vsel %vm68_vm0, %v4696_v7, 0.0  ;;  %v4666_v1 = vadd.f32 %v5761_v22, %v4662_v28 }
0x12bf   :  { %v4706_v55 = vadd.f32 %v4705_v30, %v4704_v42  ;;  %v4699_v45 = vmul.f32 %v4694_v8, %v4667_v40 }
0x12c0   :  { %v4698_v48 = vmul.f32 %v4689_v59, %v4666_v1 }
0x12c1   :  { %v4709_v47 = vsel %vm68_vm0, %v4699_v45, 0.0 }
0x12c2   :  { %v4707_v12 = vsel %vm68_vm0, %v4698_v48, 0.0 }
0x12c3   :  { %v4708_v57 = vadd.f32 %v4707_v12, %v4706_v55 }
0x12c5   :  { %v4710_v53 = vadd.f32 %v4709_v47, %v4708_v57 }
0x12c7   :  { %v4711_v58 = vrot.slane %v4710_v53, 4 }
0x12c9   :  { %v4712_v43 = vadd.f32 %v4711_v58, %v4710_v53 }
0x12cb   :  { %v4713_v13 = vrot.slane %v4712_v43, 2 }
0x12cd   :  { %v4714_v52 = vadd.f32 %v4713_v13, %v4712_v43 }
0x12cf   :  { %v4715_v51 = vrot.slane %v4714_v52, 1 }
0x12d1   :  { %v4716_v41 = vadd.f32 %v4715_v51, %v4714_v52 }
0x12d3   :  { %v4730_v26 = vmul.f32 %v4716_v41, %v1817_v39 }
0x12d5   :  { %v4732_v20 = vsel %vm68_vm0, %v4730_v26, 0.0 }
0x12d6   :  { %4733 = vadd.xlane.f32.xlu1 %v4732_v20 }
0x12e7   :  { %v5578_v62 = vpop.f32.mrb[36].mxu0 }
0x12e8   :  { %v5762_v32 = vadd.f32 %v5578_v62, %v6869_v46  ;;  %v4633_v44 = vpop.f32.mrb[37].mxu0 }
0x12e9   :  { %v5763_v19 = vadd.f32 %v4633_v44, %v6871_v18 }
0x12ea   :  { %v4669_v17 = vadd.f32 %v5762_v32, %v4662_v28 }
0x12eb   :  { %v4668_v31 = vadd.f32 %v5763_v19, %v4662_v28  ;;  %v5581_v34 = vpop.f32.mrb[38].mxu0 }
0x12ec   :  { %v4701_v60 = vmul.f32 %v4684_v25, %v4669_v17  ;;  %v5764_v35 = vadd.f32 %v5581_v34, %v6873_v16  ;;  %v4643_v38 = vpop.f32.mrb[39].mxu0 }
0x12ed   :  { %v4700_v0 = vmul.f32 %v4679_v4, %v4668_v31  ;;  %v5765_v14 = vadd.f32 %v4643_v38, %v6875_v37 }
0x12ee   :  { %v4718_v23 = vsel %vm68_vm0, %v4701_v60, 0.0  ;;  %v4671_v50 = vadd.f32 %v5764_v35, %v4662_v28 }
0x12ef   :  { %v4717_v15 = vsel %vm68_vm0, %v4700_v0, 0.0  ;;  %v4670_v24 = vadd.f32 %v5765_v14, %v4662_v28 }
0x12f0   :  { %v4719_v46 = vadd.f32 %v4718_v23, %v4717_v15  ;;  %v4703_v3 = vmul.f32 %v4694_v8, %v4671_v50  ;;  %v4739_v8 = vstv %s7095_s5 }
0x12f1   :  { %v4702_v54 = vmul.f32 %v4689_v59, %v4670_v24  ;;  %v4745_v59 = vand.u32 127, %v64_v9 }
0x12f2   :  { %v4722_v25 = vsel %vm68_vm0, %v4703_v3, 0.0 }
0x12f3   :  { %v4720_v18 = vsel %vm68_vm0, %v4702_v54, 0.0  ;;  %v4748_v61 = vsub.s32 %v4745_v59, %v6306_v10 }
0x12f4   :  { %v4721_v5 = vadd.f32 %v4720_v18, %v4719_v46 }
0x12f6   :  { %v4723_v27 = vadd.f32 %v4722_v25, %v4721_v5 }
0x12f8   :  { %v4724_v16 = vrot.slane %v4723_v27, 4 }
0x12fa   :  { %v4725_v6 = vadd.f32 %v4724_v16, %v4723_v27 }
0x12fc   :  { %v4726_v49 = vrot.slane %v4725_v6, 2 }
0x12fe   :  { %v4727_v63 = vadd.f32 %v4726_v49, %v4725_v6 }
0x1300   :  { %v4728_v37 = vrot.slane %v4727_v63, 1 }
0x1302   :  { %v4729_v4 = vadd.f32 %v4728_v37, %v4727_v63 }
0x1304   :  { %v4731_v2 = vmul.f32 %v4729_v4, %v1818_v56 }
0x1306   :  { %v4735_v28 = vsel %vm68_vm0, %v4731_v2, 0.0 }
0x1307   :  { %4736 = vadd.xlane.f32.xlu0 %v4735_v28 }
0x1363   :  { %v4734_v29 = vpop.xlane.xlu1 %4733 }
0x1364   :  { %v4740_v21 = vadd.f32 %v4739_v8, %v4734_v29 }
0x1366   :  { %v4749_v11 = vrot.slane %v4740_v21, %v4748_v61 }
0x1394   :  { %v4737_v33 = vpop.xlane.xlu0 %4736 }
0x1395   :  { %v4741_v7 = vadd.f32 %v4739_v8, %v4737_v33 }
0x1397   :  { %v4753_v22 = vrot.slane %v4741_v7, %v4748_v61 }
0x1399   :  { %v4755_v40 = vsel %vm4754_vm4, %v4753_v22, %v4749_v11 }
0x139a   :  { %4758 = vst.msk [vmem:[#allocation8] sm:$0x3] %vm4757_vm5, %v4755_v40 }
0x139b   :  { %6187 = shalt.err (!%p6184_p6)
}
0x139c   :  { %s6188_s24 = scalar_lea.hbm %s7096_s6, 32 }
0x139d   :  { %p6189_p7 = scmp.ne.s32.totalorder %s7096_s6, %s6188_s24  ;;  %p6192_p8 = scmp.lt.u32.totalorder %s6188_s24, %s7096_s6 }
0x139f   :  { %p6194_p9 = pnand %p6192_p8, %p6189_p7 }
0x13a1   :  { %6197 = shalt.err (!%p6194_p9)
}
0x13a2   :  { %4768 = dma.vmem_to_hbm [thread:$0]  %s4766_s22, 32, %s7096_s6, [#allocation5]  }
0x13a3   :  { %6202 = dma.done.wait [#allocation5], 32  }
0x13a4   :  { %6203 = vsyncadd [#allocation5], 4294967264 }
0x13a5   :  { %4772 = vsyncpa [#allocation4], 1 }
0x13a6   :  { %4773 = vsyncpa [#allocation7], 1 }
0x13a7   :  { %4774 = vsyncpa [#allocation5], 1 }

</bundles_post_ra>
